<compile_context>
chip_gen: v7x
topology: tpu7x:2x2x1
jax: 0.10.0
libtpu: 0.0.40
codegen_flags: <defaults>
</compile_context>

<pallas_src>
import numpy as np
import jax
import jax.numpy as jnp
from jax.experimental import pallas as pl
from jax.experimental.pallas import tpu as pltpu


def _round_up(n, m):
    return ((n + m - 1) // m) * m


# ----------------------------------------------------------------------------
# Kernel
# ----------------------------------------------------------------------------

def ffn_kernel(x_ref, gamma_ref, beta_ref, w1_ref, b1_ref, w2_ref, b2_ref,
               out_ref, xn_ref, acc_ref):
    """Grid = (row_tiles, hid_chunks).  Per (i, k):

    x_ref, out_ref     : [TILE_M, D]        row tile (resident across k)
    gamma/beta/b2_ref  : [1, D]             f32 (constant blocks)
    w1_ref             : [D, HID_CHUNK]     bf16 chunk of W1^T (streamed over k)
    b1_ref             : [1, HID_CHUNK]     f32 chunk
    w2_ref             : [HID_CHUNK, D]     bf16 chunk of W2^T (streamed over k)
    xn_ref (scratch)   : [TILE_M, D] bf16   LayerNorm output, computed once at k==0
    acc_ref (scratch)  : [TILE_M, D] f32    residual + sum_k relu(xn@W1_k+b1_k)@W2_k
    """
    k = pl.program_id(1)

    @pl.when(k == 0)
    def _():
        x = x_ref[...].astype(jnp.float32)
        # LayerNorm(d_in, eps=1e-6); one-pass biased variance, stats in f32.
        mean = jnp.mean(x, axis=-1, keepdims=True)
        var = jnp.maximum(jnp.mean(x * x, axis=-1, keepdims=True) - mean * mean, 0.0)
        scale = jax.lax.rsqrt(var + 1e-6) * gamma_ref[...]
        xn = (x - mean) * scale + beta_ref[...]
        xn_ref[...] = xn.astype(jnp.bfloat16)
        # Residual + final bias, added once up front.
        acc_ref[...] = x + b2_ref[...]

    # Two MXU matmuls (bf16 inputs, f32 accumulation) on this d_hid chunk.
    h = jnp.dot(xn_ref[...], w1_ref[...],
                preferred_element_type=jnp.float32) + b1_ref[...]
    h = jnp.maximum(h, 0.0)
    acc_ref[...] += jnp.dot(h.astype(jnp.bfloat16), w2_ref[...],
                            preferred_element_type=jnp.float32)

    # TODO(synk): nn.Dropout(0.1) is treated as identity (eval/inference mode).
    @pl.when(k == pl.num_programs(1) - 1)
    def _():
        out_ref[...] = acc_ref[...].astype(out_ref.dtype)


# ----------------------------------------------------------------------------
# Sizing helpers (generation-aware)
# ----------------------------------------------------------------------------

def _vmem_limits():
    """(vmem_limit_bytes, tile-sizing budget) derived from the chip's VMEM capacity."""
    phys = None
    try:
        phys = int(pltpu.get_tpu_info().vmem_capacity_bytes)
    except Exception:
        phys = None
    if not phys or phys <= 0:
        phys = 64 * 1024 * 1024                       # conservative: v7x per-TC size
    limit = min(phys * 3 // 4, 100 * 1024 * 1024)     # ~48 MiB v7x, ~96 MiB v5e/v6e
    limit = max(limit, 32 * 1024 * 1024)
    return int(limit), int(limit * 0.85)


def _num_tensorcores():
    """Best-effort TensorCore count per chip (v7x = 2); safe fallback = 1."""
    try:
        info = pltpu.get_tpu_info()
        for attr in ("num_tensorcores", "tensorcores_per_chip", "num_cores"):
            v = getattr(info, attr, None)
            if isinstance(v, int) and v >= 1:
                return min(v, 2)
    except Exception:
        pass
    return 1


def _choose_hid_chunk(d_hid, max_chunk=512):
    """Lane-aligned (multiple of 128) chunk of the hidden dimension."""
    if d_hid <= max_chunk:
        return _round_up(d_hid, 128)
    for c in range(max_chunk, 127, -128):
        if d_hid % c == 0:
            return c
    return max_chunk          # caller pads d_hid up to a multiple of max_chunk


def _pick_tile_m(n_rows, d_in, hid_chunk, io_bytes, budget_bytes,
                 *, max_tile=1024, num_cores=1):
    """Largest row tile (multiple of 8) fitting the VMEM budget; prefers exact divisors
    of n_rows (skips padding) and even grid lengths on multi-TensorCore chips."""
    # Resident / streamed footprint that does not scale with tile_m:
    #   double-buffered bf16 W1/W2 chunks + biases/LN params.
    resident = 8 * d_in * hid_chunk + 8 * hid_chunk + 24 * d_in
    avail = budget_bytes - resident
    # Per-row footprint: double-buffered in/out tiles, bf16 xn + f32 acc scratch,
    # f32 x temp, and the f32+bf16 `h` chunk temporaries.
    per_row = 4 * d_in * io_bytes + 10 * d_in + 6 * hid_chunk
    if avail <= per_row * 12:
        cap = 8
    else:
        cap = (int(avail // int(per_row * 1.5)) // 8) * 8
    cap = max(8, min(cap, max_tile, _round_up(n_rows, 8)))

    tile = cap
    if n_rows % 8 == 0:
        for t in range(cap, max(8, cap // 2) - 1, -8):
            if n_rows % t == 0:
                tile = t
                break

    if num_cores > 1 and tile >= 16:
        grid_m = pl.cdiv(_round_up(n_rows, tile), tile)
        if grid_m % num_cores != 0:
            t2 = max(8, ((tile // num_cores) // 8) * 8)
            tile = t2
    return tile


# ----------------------------------------------------------------------------
# Parameter preparation (hoisted out of the hot path)
# ----------------------------------------------------------------------------

def prepare_ffn_params(params, *, max_hid_chunk=512):
    """PyTorch-layout params -> kernel-ready (transposed, bf16, lane-padded) pytree.

    params: gamma/beta [d_in], w1 [d_hid, d_in], b1 [d_hid], w2 [d_in, d_hid], b2 [d_in]
    """
    d_hid, d_in = params["w1"].shape
    hid_chunk = _choose_hid_chunk(d_hid, max_hid_chunk)
    d_hid_p = _round_up(d_hid, hid_chunk)

    w1_t = params["w1"].T.astype(jnp.bfloat16)            # [d_in, d_hid]
    w2_t = params["w2"].T.astype(jnp.bfloat16)            # [d_hid, d_in]
    b1 = params["b1"].reshape(1, d_hid).astype(jnp.float32)
    if d_hid_p != d_hid:                                   # zero-pad: exactly preserves output
        w1_t = jnp.pad(w1_t, ((0, 0), (0, d_hid_p - d_hid)))
        w2_t = jnp.pad(w2_t, ((0, d_hid_p - d_hid), (0, 0)))
        b1 = jnp.pad(b1, ((0, 0), (0, d_hid_p - d_hid)))

    return {
        "gamma": params["gamma"].reshape(1, d_in).astype(jnp.float32),
        "beta": params["beta"].reshape(1, d_in).astype(jnp.float32),
        "w1_t": w1_t, "b1": b1,
        "w2_t": w2_t,
        "b2": params["b2"].reshape(1, d_in).astype(jnp.float32),
    }


# ----------------------------------------------------------------------------
# Wrapper
# ----------------------------------------------------------------------------

def positionwise_feed_forward(x, prepared, *, tile_m=None):
    """x: [..., d_in].  `prepared` comes from prepare_ffn_params()."""
    d_in = x.shape[-1]
    d_hid_p = prepared["w1_t"].shape[1]
    hid_chunk = _choose_hid_chunk(d_hid_p)
    assert d_hid_p % hid_chunk == 0
    orig_shape = x.shape

    x2 = x.reshape(-1, d_in)
    n = x2.shape[0]

    vmem_limit, vmem_budget = _vmem_limits()
    io_bytes = jnp.dtype(x.dtype).itemsize
    num_cores = _num_tensorcores()
    if tile_m is None:
        tile_m = _pick_tile_m(n, d_in, hid_chunk, io_bytes, vmem_budget,
                              num_cores=num_cores)
    tile_m = max(8, min(_round_up(tile_m, 8), _round_up(n, 8)))
    n_pad = _round_up(n, tile_m)
    if n_pad != n:
        x2 = jnp.pad(x2, ((0, n_pad - n), (0, 0)))

    grid = (n_pad // tile_m, d_hid_p // hid_chunk)
    row_spec = pl.BlockSpec((tile_m, d_in), lambda i, k: (i, 0))
    const2 = lambda i, k: (0, 0)

    flops = 4 * n_pad * d_in * d_hid_p
    bytes_accessed = (2 * n_pad * d_in * io_bytes          # x in, out
                      + 2 * 2 * d_in * d_hid_p             # bf16 W1 + W2
                      + 4 * (3 * d_in + d_hid_p))          # gamma/beta/b2 + b1

    out = pl.pallas_call(
        ffn_kernel,
        out_shape=jax.ShapeDtypeStruct((n_pad, d_in), x.dtype),
        grid=grid,
        in_specs=[row_spec,                                         # x
                  pl.BlockSpec((1, d_in), const2),                  # gamma
                  pl.BlockSpec((1, d_in), const2),                  # beta
                  pl.BlockSpec((d_in, hid_chunk), lambda i, k: (0, k)),   # W1^T chunk
                  pl.BlockSpec((1, hid_chunk), lambda i, k: (0, k)),      # b1 chunk
                  pl.BlockSpec((hid_chunk, d_in), lambda i, k: (k, 0)),   # W2^T chunk
                  pl.BlockSpec((1, d_in), const2)],                 # b2
        out_specs=row_spec,
        scratch_shapes=[pltpu.VMEM((tile_m, d_in), jnp.bfloat16),   # xn
                        pltpu.VMEM((tile_m, d_in), jnp.float32)],   # accumulator
        input_output_aliases={0: 0},                                # reuse x's HBM buffer
        compiler_params=pltpu.CompilerParams(
            dimension_semantics=("parallel", "arbitrary"),
            vmem_limit_bytes=vmem_limit),
        cost_estimate=pl.CostEstimate(flops=flops,
                                      bytes_accessed=bytes_accessed,
                                      transcendentals=n_pad),
    )(x2, prepared["gamma"], prepared["beta"],
      prepared["w1_t"], prepared["b1"], prepared["w2_t"], prepared["b2"])

    if n_pad != n:
        out = out[:n]
    return out.reshape(orig_shape)


# ----------------------------------------------------------------------------
# Pure-JAX reference (f32) for correctness checking
# ----------------------------------------------------------------------------

def ffn_reference(x, params):
    xf = x.astype(jnp.float32)
    mean = jnp.mean(xf, axis=-1, keepdims=True)
    var = jnp.mean((xf - mean) ** 2, axis=-1, keepdims=True)
    xn = (xf - mean) / jnp.sqrt(var + 1e-6) * params["gamma"] + params["beta"]
    h = jax.nn.relu(xn @ params["w1"].T + params["b1"])
    y = h @ params["w2"].T + params["b2"]
    return (xf + y).astype(x.dtype)


# ----------------------------------------------------------------------------
# Demo
# ----------------------------------------------------------------------------

if __name__ == "__main__":
    # Small, lane-dense shapes: N = 4*60 = 240 rows (240 divides exactly -> no padding).
    B, S, d_in, d_hid = 4, 60, 128, 512

    key = jax.random.PRNGKey(0)
    k = jax.random.split(key, 7)
    x = jax.random.normal(k[0], (B, S, d_in), jnp.float32)
    params = {
        "gamma": 1.0 + 0.1 * jax.random.normal(k[1], (d_in,), jnp.float32),
        "beta": 0.1 * jax.random.normal(k[2], (d_in,), jnp.float32),
        "w1": jax.random.normal(k[3], (d_hid, d_in), jnp.float32) / np.sqrt(d_in),
        "b1": 0.02 * jax.random.normal(k[4], (d_hid,), jnp.float32),
        "w2": jax.random.normal(k[5], (d_in, d_hid), jnp.float32) / np.sqrt(d_hid),
        "b2": 0.02 * jax.random.normal(k[6], (d_in,), jnp.float32),
    }

    prepared = jax.tree_util.tree_map(jnp.asarray, prepare_ffn_params(params))

    fwd = jax.jit(positionwise_feed_forward)
    out = fwd(x, prepared)
    jax.block_until_ready(out)

    ref = ffn_reference(x, params)
    assert out.shape == x.shape
    assert bool(jnp.all(jnp.isfinite(out)))
    max_err = float(jnp.max(jnp.abs(out.astype(jnp.float32) - ref)))
    assert max_err < 5e-2, f"max abs err {max_err}"
    print("KERNEL_OK")
</pallas_src>

<mosaic_0001>
module attributes {stable_mosaic.version = 11 : i64} {
  func.func @ffn_kernel(%arg0: i32, %arg1: i32, %arg2: memref<240x128xf32, #tpu.memory_space<vmem>>, %arg3: memref<1x128xf32, #tpu.memory_space<vmem>>, %arg4: memref<1x128xf32, #tpu.memory_space<vmem>>, %arg5: memref<128x512xbf16, #tpu.memory_space<vmem>>, %arg6: memref<1x512xf32, #tpu.memory_space<vmem>>, %arg7: memref<512x128xbf16, #tpu.memory_space<vmem>>, %arg8: memref<1x128xf32, #tpu.memory_space<vmem>>, %arg9: memref<240x128xf32, #tpu.memory_space<vmem>>, %arg10: memref<240x128xbf16, #tpu.memory_space<vmem>>, %arg11: memref<240x128xf32, #tpu.memory_space<vmem>>) attributes {dimension_semantics = [#tpu.dimension_semantics<parallel>, #tpu.dimension_semantics<arbitrary>], iteration_bounds = array<i64: 1, 1>, scalar_prefetch = 0 : i64, scratch_operands = 2 : i64, tpu.core_type = #tpu.core_type<tc>, window_params = [{transform_indices = @transform_0, window_bounds = array<i64: 240, 128>}, {pipeline_mode = #tpu.pipeline_mode<synchronous>, transform_indices = @transform_1, window_bounds = array<i64: 1, 128>}, {pipeline_mode = #tpu.pipeline_mode<synchronous>, transform_indices = @transform_2, window_bounds = array<i64: 1, 128>}, {transform_indices = @transform_3, window_bounds = array<i64: 128, 512>}, {transform_indices = @transform_4, window_bounds = array<i64: 1, 512>}, {transform_indices = @transform_5, window_bounds = array<i64: 512, 128>}, {pipeline_mode = #tpu.pipeline_mode<synchronous>, transform_indices = @transform_6, window_bounds = array<i64: 1, 128>}, {transform_indices = @transform_7, window_bounds = array<i64: 240, 128>}]} {
    %c0_i32 = arith.constant 0 : i32
    %0 = arith.cmpi eq, %arg1, %c0_i32 : i32
    %1 = arith.extui %0 : i1 to i32
    %c0_i32_0 = arith.constant 0 : i32
    %2 = arith.cmpi ne, %1, %c0_i32_0 : i32
    scf.if %2 {
      %c0_16 = arith.constant 0 : index
      %c0_17 = arith.constant 0 : index
      %20 = vector.load %arg2[%c0_16, %c0_17] : memref<240x128xf32, #tpu.memory_space<vmem>>, vector<240x128xf32>
      %cst_18 = arith.constant dense<0.000000e+00> : vector<240xf32>
      %21 = vector.multi_reduction <add>, %20, %cst_18 [1] : vector<240x128xf32> to vector<240xf32>
      %22 = vector.shape_cast %21 : vector<240xf32> to vector<240x1xf32>
      %cst_19 = arith.constant 1.280000e+02 : f32
      %23 = vector.broadcast %cst_19 : f32 to vector<240x1xf32>
      %24 = arith.divf %22, %23 : vector<240x1xf32>
      %25 = arith.mulf %20, %20 : vector<240x128xf32>
      %cst_20 = arith.constant dense<0.000000e+00> : vector<240xf32>
      %26 = vector.multi_reduction <add>, %25, %cst_20 [1] : vector<240x128xf32> to vector<240xf32>
      %27 = vector.shape_cast %26 : vector<240xf32> to vector<240x1xf32>
      %cst_21 = arith.constant 1.280000e+02 : f32
      %28 = vector.broadcast %cst_21 : f32 to vector<240x1xf32>
      %29 = arith.divf %27, %28 : vector<240x1xf32>
      %30 = arith.mulf %24, %24 : vector<240x1xf32>
      %31 = arith.subf %29, %30 : vector<240x1xf32>
      %cst_22 = arith.constant 0.000000e+00 : f32
      %32 = vector.broadcast %cst_22 : f32 to vector<240x1xf32>
      %33 = arith.maximumf %31, %32 : vector<240x1xf32>
      %cst_23 = arith.constant 9.99999997E-7 : f32
      %34 = vector.broadcast %cst_23 : f32 to vector<240x1xf32>
      %35 = arith.addf %33, %34 : vector<240x1xf32>
      %36 = math.rsqrt %35 : vector<240x1xf32>
      %c0_24 = arith.constant 0 : index
      %c0_25 = arith.constant 0 : index
      %37 = vector.load %arg3[%c0_24, %c0_25] : memref<1x128xf32, #tpu.memory_space<vmem>>, vector<1x128xf32>
      %38 = vector.broadcast %36 : vector<240x1xf32> to vector<240x128xf32>
      %39 = vector.broadcast %37 : vector<1x128xf32> to vector<240x128xf32>
      %40 = arith.mulf %38, %39 : vector<240x128xf32>
      %41 = vector.broadcast %24 : vector<240x1xf32> to vector<240x128xf32>
      %42 = arith.subf %20, %41 : vector<240x128xf32>
      %43 = arith.mulf %42, %40 : vector<240x128xf32>
      %c0_26 = arith.constant 0 : index
      %c0_27 = arith.constant 0 : index
      %44 = vector.load %arg4[%c0_26, %c0_27] : memref<1x128xf32, #tpu.memory_space<vmem>>, vector<1x128xf32>
      %45 = vector.broadcast %44 : vector<1x128xf32> to vector<240x128xf32>
      %46 = arith.addf %43, %45 : vector<240x128xf32>
      %47 = arith.truncf %46 : vector<240x128xf32> to vector<240x128xbf16>
      %c0_28 = arith.constant 0 : index
      %c0_29 = arith.constant 0 : index
      %48 = vector.load %arg10[%c0_28, %c0_29] : memref<240x128xbf16, #tpu.memory_space<vmem>>, vector<240x128xbf16>
      tpu.vector_store %arg10[%c0_28, %c0_29], %47 {strides = array<i32>} : memref<240x128xbf16, #tpu.memory_space<vmem>>, vector<240x128xbf16>,
      %c0_30 = arith.constant 0 : index
      %c0_31 = arith.constant 0 : index
      %49 = vector.load %arg8[%c0_30, %c0_31] : memref<1x128xf32, #tpu.memory_space<vmem>>, vector<1x128xf32>
      %50 = vector.broadcast %49 : vector<1x128xf32> to vector<240x128xf32>
      %51 = arith.addf %20, %50 : vector<240x128xf32>
      %c0_32 = arith.constant 0 : index
      %c0_33 = arith.constant 0 : index
      %52 = vector.load %arg11[%c0_32, %c0_33] : memref<240x128xf32, #tpu.memory_space<vmem>>, vector<240x128xf32>
      tpu.vector_store %arg11[%c0_32, %c0_33], %51 {strides = array<i32>} : memref<240x128xf32, #tpu.memory_space<vmem>>, vector<240x128xf32>,
    } else {
    }
    %c0 = arith.constant 0 : index
    %c0_1 = arith.constant 0 : index
    %3 = vector.load %arg10[%c0, %c0_1] : memref<240x128xbf16, #tpu.memory_space<vmem>>, vector<240x128xbf16>
    %c0_2 = arith.constant 0 : index
    %c0_3 = arith.constant 0 : index
    %4 = vector.load %arg5[%c0_2, %c0_3] : memref<128x512xbf16, #tpu.memory_space<vmem>>, vector<128x512xbf16>
    %cst = arith.constant dense<0.000000e+00> : vector<240x512xf32>
    %5 = tpu.matmul %3, %4, %cst {dimension_numbers = #tpu.dot_dimension_numbers<[1], [0], [0], [1], [0, 0, 1, 1], [], []>} : vector<240x128xbf16>, vector<128x512xbf16>, vector<240x512xf32> -> vector<240x512xf32>
    %c0_4 = arith.constant 0 : index
    %c0_5 = arith.constant 0 : index
    %6 = vector.load %arg6[%c0_4, %c0_5] : memref<1x512xf32, #tpu.memory_space<vmem>>, vector<1x512xf32>
    %7 = vector.broadcast %6 : vector<1x512xf32> to vector<240x512xf32>
    %8 = arith.addf %5, %7 : vector<240x512xf32>
    %cst_6 = arith.constant 0.000000e+00 : f32
    %9 = vector.broadcast %cst_6 : f32 to vector<240x512xf32>
    %10 = arith.maximumf %8, %9 : vector<240x512xf32>
    %c0_7 = arith.constant 0 : index
    %c0_8 = arith.constant 0 : index
    %11 = vector.load %arg11[%c0_7, %c0_8] : memref<240x128xf32, #tpu.memory_space<vmem>>, vector<240x128xf32>
    %12 = arith.truncf %10 : vector<240x512xf32> to vector<240x512xbf16>
    %c0_9 = arith.constant 0 : index
    %c0_10 = arith.constant 0 : index
    %13 = vector.load %arg7[%c0_9, %c0_10] : memref<512x128xbf16, #tpu.memory_space<vmem>>, vector<512x128xbf16>
    %cst_11 = arith.constant dense<0.000000e+00> : vector<240x128xf32>
    %14 = tpu.matmul %12, %13, %cst_11 {dimension_numbers = #tpu.dot_dimension_numbers<[1], [0], [0], [1], [0, 0, 1, 1], [], []>} : vector<240x512xbf16>, vector<512x128xbf16>, vector<240x128xf32> -> vector<240x128xf32>
    %15 = arith.addf %11, %14 : vector<240x128xf32>
    %c0_12 = arith.constant 0 : index
    %c0_13 = arith.constant 0 : index
    %16 = vector.load %arg11[%c0_12, %c0_13] : memref<240x128xf32, #tpu.memory_space<vmem>>, vector<240x128xf32>
    tpu.vector_store %arg11[%c0_12, %c0_13], %15 {strides = array<i32>} : memref<240x128xf32, #tpu.memory_space<vmem>>, vector<240x128xf32>,
    %c0_i32_14 = arith.constant 0 : i32
    %17 = arith.cmpi eq, %arg1, %c0_i32_14 : i32
    %18 = arith.extui %17 : i1 to i32
    %c0_i32_15 = arith.constant 0 : i32
    %19 = arith.cmpi ne, %18, %c0_i32_15 : i32
    scf.if %19 {
      %c0_16 = arith.constant 0 : index
      %c0_17 = arith.constant 0 : index
      %20 = vector.load %arg11[%c0_16, %c0_17] : memref<240x128xf32, #tpu.memory_space<vmem>>, vector<240x128xf32>
      %c0_18 = arith.constant 0 : index
      %c0_19 = arith.constant 0 : index
      %21 = vector.load %arg9[%c0_18, %c0_19] : memref<240x128xf32, #tpu.memory_space<vmem>>, vector<240x128xf32>
      tpu.vector_store %arg9[%c0_18, %c0_19], %20 {strides = array<i32>} : memref<240x128xf32, #tpu.memory_space<vmem>>, vector<240x128xf32>,
    } else {
    }
    return
  }
  func.func @transform_0(%arg0: i32, %arg1: i32) -> (i32, i32) {
    %c0_i32 = arith.constant 0 : i32
    %c0_i32_0 = arith.constant 0 : i32
    return %arg0, %c0_i32 : i32, i32
  }
  func.func @transform_1(%arg0: i32, %arg1: i32) -> (i32, i32) {
    %c0_i32 = arith.constant 0 : i32
    %c0_i32_0 = arith.constant 0 : i32
    %c0_i32_1 = arith.constant 0 : i32
    return %c0_i32, %c0_i32_0 : i32, i32
  }
  func.func @transform_2(%arg0: i32, %arg1: i32) -> (i32, i32) {
    %c0_i32 = arith.constant 0 : i32
    %c0_i32_0 = arith.constant 0 : i32
    %c0_i32_1 = arith.constant 0 : i32
    return %c0_i32, %c0_i32_0 : i32, i32
  }
  func.func @transform_3(%arg0: i32, %arg1: i32) -> (i32, i32) {
    %c0_i32 = arith.constant 0 : i32
    %c0_i32_0 = arith.constant 0 : i32
    return %c0_i32, %arg1 : i32, i32
  }
  func.func @transform_4(%arg0: i32, %arg1: i32) -> (i32, i32) {
    %c0_i32 = arith.constant 0 : i32
    %c0_i32_0 = arith.constant 0 : i32
    return %c0_i32, %arg1 : i32, i32
  }
  func.func @transform_5(%arg0: i32, %arg1: i32) -> (i32, i32) {
    %c0_i32 = arith.constant 0 : i32
    %c0_i32_0 = arith.constant 0 : i32
    return %arg1, %c0_i32 : i32, i32
  }
  func.func @transform_6(%arg0: i32, %arg1: i32) -> (i32, i32) {
    %c0_i32 = arith.constant 0 : i32
    %c0_i32_0 = arith.constant 0 : i32
    %c0_i32_1 = arith.constant 0 : i32
    return %c0_i32, %c0_i32_0 : i32, i32
  }
  func.func @transform_7(%arg0: i32, %arg1: i32) -> (i32, i32) {
    %c0_i32 = arith.constant 0 : i32
    %c0_i32_0 = arith.constant 0 : i32
    return %arg0, %c0_i32 : i32, i32
  }
}

</mosaic_0001>

<bundles_post_ra>
// kernel: positionwise_feed_forward.1
= control target key start
LH: loop header
LB: loop body
LE: loop exit
PB: predicated region body
PF: predicated region fallthrough
CT: control target
= control target key end

     0   :  { %v2611_v58 = vmov 0   ;;  %s3674_s0 = inlined_call_operand.vmem [shape: f32[240,128], index: 0, kind: input, shape index: {}, may-alias: {0,7}]   ;;  %s3675_s3 = inlined_call_operand.vmem [shape: bf16[128,512], index: 3, kind: input, shape index: {}]   ;;  %s3676_s5 = inlined_call_operand.vmem [shape: bf16[512,128], index: 5, kind: input, shape index: {}]   ;;  %s3677_s1 = inlined_call_operand.vmem [shape: f32[1,128], index: 1, kind: input, shape index: {}]   ;;  %s3678_s2 = inlined_call_operand.vmem [shape: f32[1,128], index: 2, kind: input, shape index: {}]   ;;  %s3679_s4 = inlined_call_operand.vmem [shape: f32[1,512], index: 4, kind: input, shape index: {}]   ;;  %s3680_s6 = inlined_call_operand.vmem [shape: f32[1,128], index: 6, kind: input, shape index: {}]   ;;  %s3681_s7 = inlined_call_operand.vmem [shape: f32[240,128], index: 7, kind: output, shape index: {}, may-alias: {0,7}]  }
   0x1   :  { %v2655_v0 = vld [vmem:[%s3674_s0] sm:$0xff]  ;;  %v2660_v1 = vld [vmem:[%s3674_s0 + $0x8] sm:$0xff]  ;;  %v2671_v4 = vld [vmem:[%s3674_s0 + $0x10] sm:$0xff]  ;;  %914 = vmatprep.mubr.bf16.mxu0 %v2611_v58  ;;  %1097 = vmatprep.mubr.bf16.mxu1 %v2611_v58 }
   0x2   :  { %61 = vadd.xlane.f32.xlu0 %v2655_v0  ;;  %v152_v2 = vmul.f32 %v2655_v0, %v2655_v0  ;;  %v153_v3 = vmul.f32 %v2660_v1, %v2660_v1  ;;  %v2676_v5 = vld [vmem:[%s3674_s0 + $0x18] sm:$0xff]  ;;  %v154_v6 = vmul.f32 %v2671_v4, %v2671_v4  ;;  %v2687_v8 = vld [vmem:[%s3674_s0 + $0x20] sm:$0xff]  ;;  %v2692_v9 = vld [vmem:[%s3674_s0 + $0x28] sm:$0xff] }
   0x3   :  { %v155_v7 = vmul.f32 %v2676_v5, %v2676_v5  ;;  %v2427_v10 = vld [vmem:[%s3675_s3 + $0x4] ss:$16 sps:$4 sm:$0xff]   ;;  %v2429_v11 = vld [vmem:[%s3675_s3 + $0xc] ss:$16 sps:$4 sm:$0xff]   ;;  %v2431_v12 = vld [vmem:[%s3675_s3] ss:$16 sps:$4 sm:$0xff]   ;;  %v156_v14 = vmul.f32 %v2687_v8, %v2687_v8  ;;  %v157_v17 = vmul.f32 %v2692_v9, %v2692_v9 }
   0x4   :  { %182 = vadd.xlane.f32.xlu1 %v152_v2  ;;  %882 = vmatprep.subr.bf16.mxu0 %v2427_v10  ;;  %v2432_v13 = vld [vmem:[%s3675_s3 + $0x8] ss:$16 sps:$4 sm:$0xff]   ;;  %v2433_v15 = vld [vmem:[%s3675_s3 + $0x24] ss:$16 sps:$4 sm:$0xff]   ;;  %v2435_v16 = vld [vmem:[%s3675_s3 + $0x2c] ss:$16 sps:$4 sm:$0xff]  }
   0x5   :  { %1065 = vmatprep.subr.bf16.mxu1 %v2429_v11  ;;  %883 = vmatpush1.bf16.msra.mxu0 %v2431_v12  ;;  %v2437_v18 = vld [vmem:[%s3675_s3 + $0x20] ss:$16 sps:$4 sm:$0xff]   ;;  %v2438_v19 = vld [vmem:[%s3675_s3 + $0x28] ss:$16 sps:$4 sm:$0xff]   ;;  %v2439_v22 = vld [vmem:[%s3675_s3 + $0x44] ss:$16 sps:$4 sm:$0xff]  }
   0x6   :  { %63 = vadd.xlane.f32.xlu0 %v2660_v1  ;;  %1066 = vmatpush1.bf16.msra.mxu1 %v2432_v13  ;;  %v2727_v20 = vld [vmem:[%s3674_s0 + $0x30] sm:$0xff]  ;;  %v2732_v21 = vld [vmem:[%s3674_s0 + $0x38] sm:$0xff]  ;;  %v2767_v32 = vld [vmem:[%s3674_s0 + $0x40] sm:$0xff] }
   0x7   :  { %884 = vmatprep.subr.bf16.mxu0 %v2433_v15  ;;  %1067 = vmatprep.subr.bf16.mxu1 %v2435_v16  ;;  %v2441_v23 = vld [vmem:[%s3675_s3 + $0x4c] ss:$16 sps:$4 sm:$0xff]   ;;  %v2443_v24 = vld [vmem:[%s3675_s3 + $0x40] ss:$16 sps:$4 sm:$0xff]   ;;  %v2444_v25 = vld [vmem:[%s3675_s3 + $0x48] ss:$16 sps:$4 sm:$0xff]   ;;  %v158_v26 = vmul.f32 %v2727_v20, %v2727_v20  ;;  %v159_v27 = vmul.f32 %v2732_v21, %v2732_v21  ;;  %v160_v38 = vmul.f32 %v2767_v32, %v2767_v32 }
   0x8   :  { %184 = vadd.xlane.f32.xlu1 %v153_v3  ;;  %v2445_v28 = vld [vmem:[%s3675_s3 + $0x64] ss:$16 sps:$4 sm:$0xff]   ;;  %v2447_v29 = vld [vmem:[%s3675_s3 + $0x6c] ss:$16 sps:$4 sm:$0xff]   ;;  %v2449_v30 = vld [vmem:[%s3675_s3 + $0x60] ss:$16 sps:$4 sm:$0xff]  }
   0x9   :  { %885 = vmatpush1.bf16.msra.mxu0 %v2437_v18  ;;  %v2450_v31 = vld [vmem:[%s3675_s3 + $0x68] ss:$16 sps:$4 sm:$0xff]   ;;  %v2451_v33 = vld [vmem:[%s3675_s3 + $0x84] ss:$16 sps:$4 sm:$0xff]   ;;  %v2453_v34 = vld [vmem:[%s3675_s3 + $0x8c] ss:$16 sps:$4 sm:$0xff]  }
   0xa   :  { %65 = vadd.xlane.f32.xlu0 %v2671_v4  ;;  %1068 = vmatpush1.bf16.msra.mxu1 %v2438_v19  ;;  %v2778_v35 = vld [vmem:[%s3674_s0 + $0x48] sm:$0xff]  ;;  %v2455_v36 = vld [vmem:[%s3675_s3 + $0x80] ss:$16 sps:$4 sm:$0xff]   ;;  %v2457_v40 = vld [vmem:[%s3675_s3 + $0xa4] ss:$16 sps:$4 sm:$0xff]  }
   0xb   :  { %886 = vmatprep.subr.bf16.mxu0 %v2439_v22  ;;  %1069 = vmatprep.subr.bf16.mxu1 %v2441_v23  ;;  %v2456_v37 = vld [vmem:[%s3675_s3 + $0x88] ss:$16 sps:$4 sm:$0xff]   ;;  %v161_v39 = vmul.f32 %v2778_v35, %v2778_v35  ;;  %v2459_v41 = vld [vmem:[%s3675_s3 + $0xac] ss:$16 sps:$4 sm:$0xff]   ;;  %v2461_v42 = vld [vmem:[%s3675_s3 + $0xa0] ss:$16 sps:$4 sm:$0xff]  }
   0xc   :  { %67 = vadd.xlane.f32.xlu1 %v2676_v5  ;;  %v2462_v43 = vld [vmem:[%s3675_s3 + $0xa8] ss:$16 sps:$4 sm:$0xff]   ;;  %v2807_v44 = vld [vmem:[%s3674_s0 + $0x50] sm:$0xff]  ;;  %v2465_v46 = vld [vmem:[%s3675_s3 + $0xcc] ss:$16 sps:$4 sm:$0xff]  }
   0xd   :  { %887 = vmatpush1.bf16.msra.mxu0 %v2443_v24  ;;  %v2463_v45 = vld [vmem:[%s3675_s3 + $0xc4] ss:$16 sps:$4 sm:$0xff]   ;;  %v2818_v47 = vld [vmem:[%s3674_s0 + $0x58] sm:$0xff]  ;;  %v2467_v48 = vld [vmem:[%s3675_s3 + $0xc0] ss:$16 sps:$4 sm:$0xff]   ;;  %v162_v50 = vmul.f32 %v2807_v44, %v2807_v44 }
   0xe   :  { %186 = vadd.xlane.f32.xlu0 %v154_v6  ;;  %1070 = vmatpush1.bf16.msra.mxu1 %v2444_v25  ;;  %v2468_v49 = vld [vmem:[%s3675_s3 + $0xc8] ss:$16 sps:$4 sm:$0xff]   ;;  %v163_v51 = vmul.f32 %v2818_v47, %v2818_v47  ;;  %v2469_v52 = vld [vmem:[%s3675_s3 + $0xe4] ss:$16 sps:$4 sm:$0xff]   ;;  %v2471_v53 = vld [vmem:[%s3675_s3 + $0xec] ss:$16 sps:$4 sm:$0xff]  }
   0xf   :  { %888 = vmatprep.subr.bf16.mxu0 %v2445_v28  ;;  %1071 = vmatprep.subr.bf16.mxu1 %v2447_v29  ;;  %v2473_v54 = vld [vmem:[%s3675_s3 + $0xe0] ss:$16 sps:$4 sm:$0xff]   ;;  %v2474_v55 = vld [vmem:[%s3675_s3 + $0xe8] ss:$16 sps:$4 sm:$0xff]  }
  0x10   :  { %188 = vadd.xlane.f32.xlu1 %v155_v7  ;;  %v2847_v56 = vld [vmem:[%s3674_s0 + $0x60] sm:$0xff]  ;;  %v2852_v57 = vld [vmem:[%s3674_s0 + $0x68] sm:$0xff]  ;;  %v2865_v61 = vld [vmem:[%s3674_s0 + $0x70] sm:$0xff] }
  0x11   :  { %889 = vmatpush1.bf16.msra.mxu0 %v2449_v30  ;;  %v164_v59 = vmul.f32 %v2847_v56, %v2847_v56  ;;  %v165_v60 = vmul.f32 %v2852_v57, %v2852_v57  ;;  %v2870_v62 = vld [vmem:[%s3674_s0 + $0x78] sm:$0xff]  ;;  %v166_v63 = vmul.f32 %v2865_v61, %v2865_v61  ;;  %v2881_v3 = vld [vmem:[%s3674_s0 + $0x80] sm:$0xff]  ;;  %v2886_v6 = vld [vmem:[%s3674_s0 + $0x88] sm:$0xff] }
  0x12   :  { %69 = vadd.xlane.f32.xlu0 %v2687_v8  ;;  %1072 = vmatpush1.bf16.msra.mxu1 %v2450_v31  ;;  %v167_v2 = vmul.f32 %v2870_v62, %v2870_v62  ;;  %v168_v7 = vmul.f32 %v2881_v3, %v2881_v3  ;;  %v169_v10 = vmul.f32 %v2886_v6, %v2886_v6  ;;  %v49_v11 = vld [vmem:[%s3674_s0 + $0x90] sm:$0xff]  ;;  %v50_v12 = vld [vmem:[%s3674_s0 + $0x98] sm:$0xff]  ;;  %v51_v15 = vld [vmem:[%s3674_s0 + $0xa0] sm:$0xff] }
  0x13   :  { %890 = vmatprep.subr.bf16.mxu0 %v2451_v33  ;;  %1073 = vmatprep.subr.bf16.mxu1 %v2453_v34  ;;  %v170_v13 = vmul.f32 %v49_v11, %v49_v11  ;;  %v52_v16 = vld [vmem:[%s3674_s0 + $0xa8] sm:$0xff]  ;;  %v53_v19 = vld [vmem:[%s3674_s0 + $0xb0] sm:$0xff]  ;;  %v54_v22 = vld [vmem:[%s3674_s0 + $0xb8] sm:$0xff] }
  0x14   :  { %71 = vadd.xlane.f32.xlu1 %v2692_v9  ;;  %v173_v18 = vmul.f32 %v52_v16, %v52_v16  ;;  %v174_v23 = vmul.f32 %v53_v19, %v53_v19  ;;  %v175_v24 = vmul.f32 %v54_v22, %v54_v22  ;;  %v55_v25 = vld [vmem:[%s3674_s0 + $0xc0] sm:$0xff]  ;;  %v57_v29 = vld [vmem:[%s3674_s0 + $0xd0] sm:$0xff]  ;;  %v58_v30 = vld [vmem:[%s3674_s0 + $0xd8] sm:$0xff] }
  0x15   :  { %891 = vmatpush1.bf16.msra.mxu0 %v2455_v36  ;;  %v178_v31 = vmul.f32 %v57_v29, %v57_v29  ;;  %v179_v33 = vmul.f32 %v58_v30, %v58_v30  ;;  %v59_v34 = vld [vmem:[%s3674_s0 + $0xe0] sm:$0xff]  ;;  %v60_v36 = vld [vmem:[%s3674_s0 + $0xe8] sm:$0xff] }
  0x16   :  { %190 = vadd.xlane.f32.xlu0 %v156_v14  ;;  %1074 = vmatpush1.bf16.msra.mxu1 %v2456_v37  ;;  %v171_v14 = vmul.f32 %v50_v12, %v50_v12  ;;  %v180_v37 = vmul.f32 %v59_v34, %v59_v34 }
  0x17   :  { %892 = vmatprep.subr.bf16.mxu0 %v2457_v40  ;;  %1075 = vmatprep.subr.bf16.mxu1 %v2459_v41 }
  0x18   :  { %192 = vadd.xlane.f32.xlu1 %v157_v17  ;;  %v172_v17 = vmul.f32 %v51_v15, %v51_v15 }
  0x19   :  { %893 = vmatpush1.bf16.msra.mxu0 %v2461_v42 }
  0x1a   :  { %73 = vadd.xlane.f32.xlu0 %v2727_v20  ;;  %1076 = vmatpush1.bf16.msra.mxu1 %v2462_v43 }
  0x1b   :  { %894 = vmatprep.subr.bf16.mxu0 %v2463_v45  ;;  %1077 = vmatprep.subr.bf16.mxu1 %v2465_v46  ;;  %v2475_v45 = vld [vmem:[%s3676_s5 + $0x40] sm:$0xff]  }
  0x1c   :  { %75 = vadd.xlane.f32.xlu1 %v2732_v21 }
  0x1d   :  { %895 = vmatpush1.bf16.msra.mxu0 %v2467_v48  ;;  %v2476_v48 = vld [vmem:[%s3676_s5 + $0xc0] sm:$0xff]  }
  0x1e   :  { %194 = vadd.xlane.f32.xlu0 %v158_v26  ;;  %1078 = vmatpush1.bf16.msra.mxu1 %v2468_v49  ;;  %v56_v26 = vld [vmem:[%s3674_s0 + $0xc8] sm:$0xff] }
  0x1f   :  { %896 = vmatprep.subr.bf16.mxu0 %v2469_v52  ;;  %1079 = vmatprep.subr.bf16.mxu1 %v2471_v53  ;;  %v177_v28 = vmul.f32 %v56_v26, %v56_v26 }
  0x20   :  { %196 = vadd.xlane.f32.xlu1 %v159_v27  ;;  %v176_v27 = vmul.f32 %v55_v25, %v55_v25 }
  0x21   :  { %897 = vmatpush1.bf16.msra.mxu0 %v2473_v54 }
  0x22   :  { %77 = vadd.xlane.f32.xlu0 %v2767_v32  ;;  %1080 = vmatpush1.bf16.msra.mxu1 %v2474_v55 }
  0x23   :  { %2214 = vmatprep.subr.bf16.mxu0 %v2475_v45  ;;  %2320 = vmatprep.subr.bf16.mxu1 %v2476_v48 }
  0x24   :  { %79 = vadd.xlane.f32.xlu1 %v2778_v35 }
  0x26   :  { %198 = vadd.xlane.f32.xlu0 %v160_v38  ;;  %v181_v38 = vmul.f32 %v60_v36, %v60_v36 }
  0x28   :  { %200 = vadd.xlane.f32.xlu1 %v161_v39 }
  0x2a   :  { %81 = vadd.xlane.f32.xlu0 %v2807_v44 }
  0x2c   :  { %83 = vadd.xlane.f32.xlu1 %v2818_v47 }
  0x2e   :  { %202 = vadd.xlane.f32.xlu0 %v162_v50 }
  0x30   :  { %204 = vadd.xlane.f32.xlu1 %v163_v51 }
  0x32   :  { %85 = vadd.xlane.f32.xlu0 %v2847_v56 }
  0x34   :  { %87 = vadd.xlane.f32.xlu1 %v2852_v57 }
  0x36   :  { %206 = vadd.xlane.f32.xlu0 %v164_v59 }
  0x38   :  { %208 = vadd.xlane.f32.xlu1 %v165_v60 }
  0x3a   :  { %89 = vadd.xlane.f32.xlu0 %v2865_v61 }
  0x3c   :  { %91 = vadd.xlane.f32.xlu1 %v2870_v62 }
  0x3e   :  { %210 = vadd.xlane.f32.xlu0 %v166_v63 }
  0x40   :  { %212 = vadd.xlane.f32.xlu1 %v167_v2 }
  0x42   :  { %93 = vadd.xlane.f32.xlu0 %v2881_v3 }
  0x44   :  { %95 = vadd.xlane.f32.xlu1 %v2886_v6 }
  0x46   :  { %214 = vadd.xlane.f32.xlu0 %v168_v7 }
  0x48   :  { %216 = vadd.xlane.f32.xlu1 %v169_v10 }
  0x4a   :  { %97 = vadd.xlane.f32.xlu0 %v49_v11 }
  0x4c   :  { %99 = vadd.xlane.f32.xlu1 %v50_v12 }
  0x4e   :  { %218 = vadd.xlane.f32.xlu0 %v170_v13 }
  0x50   :  { %220 = vadd.xlane.f32.xlu1 %v171_v14 }
  0x52   :  { %101 = vadd.xlane.f32.xlu0 %v51_v15 }
  0x54   :  { %103 = vadd.xlane.f32.xlu1 %v52_v16 }
  0x56   :  { %222 = vadd.xlane.f32.xlu0 %v172_v17 }
  0x58   :  { %224 = vadd.xlane.f32.xlu1 %v173_v18 }
  0x5a   :  { %105 = vadd.xlane.f32.xlu0 %v53_v19 }
  0x5c   :  { %107 = vadd.xlane.f32.xlu1 %v54_v22 }
  0x5e   :  { %226 = vadd.xlane.f32.xlu0 %v174_v23 }
  0x60   :  { %228 = vadd.xlane.f32.xlu1 %v175_v24 }
  0x62   :  { %109 = vadd.xlane.f32.xlu0 %v55_v25 }
  0x64   :  { %111 = vadd.xlane.f32.xlu1 %v56_v26 }
  0x66   :  { %230 = vadd.xlane.f32.xlu0 %v176_v27 }
  0x68   :  { %232 = vadd.xlane.f32.xlu1 %v177_v28 }
  0x6a   :  { %113 = vadd.xlane.f32.xlu0 %v57_v29  ;;  %v2959_v29 = vld [vmem:[%s3677_s1] ss:$0 sm:$0xff] }
  0x6c   :  { %115 = vadd.xlane.f32.xlu1 %v58_v30 }
  0x6e   :  { %234 = vadd.xlane.f32.xlu0 %v178_v31 }
  0x70   :  { %236 = vadd.xlane.f32.xlu1 %v179_v33 }
  0x72   :  { %117 = vadd.xlane.f32.xlu0 %v59_v34 }
  0x74   :  { %119 = vadd.xlane.f32.xlu1 %v60_v36 }
  0x76   :  { %238 = vadd.xlane.f32.xlu0 %v180_v37 }
  0x78   :  { %240 = vadd.xlane.f32.xlu1 %v181_v38 }
  0x8f   :  { %v62_v39 = vpop.xlane.xlu0 %61 }
  0x90   :  { %v2930_v40 = vmul.f32 0.0078125, %v62_v39 }
  0x91   :  { %v183_v41 = vpop.xlane.xlu1 %182 }
  0x92   :  { %v272_v42 = vmul.f32 %v2930_v40, %v2930_v40  ;;  %v242_v43 = vmul.f32 0.0078125, %v183_v41 }
  0x93   :  { %v64_v46 = vpop.xlane.xlu0 %63 }
  0x94   :  { %v302_v49 = vsub.f32 %v242_v43, %v272_v42  ;;  %v2940_v50 = vmul.f32 0.0078125, %v64_v46  ;;  %v459_v43 = vsub.f32 %v2655_v0, %v2930_v40 }
  0x95   :  { %v185_v51 = vpop.xlane.xlu1 %184 }
  0x96   :  { %v332_v52 = vmax.f32 %v302_v49, 0.0  ;;  %v273_v53 = vmul.f32 %v2940_v50, %v2940_v50  ;;  %v243_v54 = vmul.f32 0.0078125, %v185_v51 }
  0x97   :  { %v66_v55 = vpop.xlane.xlu0 %65 }
  0x98   :  { %v362_v59 = vadd.f32 1e-06, %v332_v52  ;;  %v303_v60 = vsub.f32 %v243_v54, %v273_v53  ;;  %v2944_v63 = vmul.f32 0.0078125, %v66_v55  ;;  %v460_v52 = vsub.f32 %v2660_v1, %v2940_v50 }
  0x99   :  { %v68_v2 = vpop.xlane.xlu1 %67 }
  0x9a   :  { %2507 = vrsqrt.f32 %v362_v59  ;;  %v333_v7 = vmax.f32 %v303_v60, 0.0  ;;  %v274_v10 = vmul.f32 %v2944_v63, %v2944_v63  ;;  %v2948_v11 = vmul.f32 0.0078125, %v68_v2  ;;  %v2976_v59 = vld [vmem:[%s3678_s2] ss:$0 sm:$0xff] }
  0x9b   :  { %v187_v12 = vpop.xlane.xlu0 %186 }
  0x9c   :  { %v363_v13 = vadd.f32 1e-06, %v333_v7  ;;  %v244_v14 = vmul.f32 0.0078125, %v187_v12  ;;  %v275_v16 = vmul.f32 %v2948_v11, %v2948_v11 }
  0x9d   :  { %v189_v15 = vpop.xlane.xlu1 %188 }
  0x9e   :  { %2509 = vrsqrt.f32 %v363_v13  ;;  %v304_v17 = vsub.f32 %v244_v14, %v274_v10  ;;  %v245_v18 = vmul.f32 0.0078125, %v189_v15  ;;  %v2477_v15 = vld [vmem:[%s3676_s5] sm:$0xff]  }
  0x9f   :  { %v70_v19 = vpop.xlane.xlu0 %69 }
  0xa0   :  { %v334_v22 = vmax.f32 %v304_v17, 0.0  ;;  %v305_v23 = vsub.f32 %v245_v18, %v275_v16  ;;  %v2952_v24 = vmul.f32 0.0078125, %v70_v19  ;;  %v2478_v16 = vld [vmem:[%s3676_s5 + $0x80] sm:$0xff]  }
  0xa1   :  { %v72_v25 = vpop.xlane.xlu1 %71 }
  0xa2   :  { %v364_v26 = vadd.f32 1e-06, %v334_v22  ;;  %v335_v27 = vmax.f32 %v305_v23, 0.0  ;;  %v276_v28 = vmul.f32 %v2952_v24, %v2952_v24  ;;  %v2961_v30 = vmul.f32 0.0078125, %v72_v25  ;;  %v2479_v23 = vld [vmem:[%s3676_s5 + $0x48] sm:$0xff]  }
  0xa3   :  { %v191_v31 = vpop.xlane.xlu0 %190  ;;  %v461_v25 = vsub.f32 %v2671_v4, %v2944_v63 }
  0xa4   :  { %v2508_v33 = vpop.eup %2507  ;;  %2511 = vrsqrt.f32 %v364_v26  ;;  %v365_v34 = vadd.f32 1e-06, %v335_v27  ;;  %v246_v36 = vmul.f32 0.0078125, %v191_v31  ;;  %v277_v39 = vmul.f32 %v2961_v30, %v2961_v30  ;;  %v2480_v31 = vld [vmem:[%s3676_s5 + $0xc8] sm:$0xff]  }
  0xa5   :  { %v193_v37 = vpop.xlane.xlu1 %192  ;;  %v429_v38 = vmul.f32 %v2508_v33, %v2959_v29 }
  0xa6   :  { %2513 = vrsqrt.f32 %v365_v34  ;;  %v306_v41 = vsub.f32 %v246_v36, %v276_v28  ;;  %v247_v42 = vmul.f32 0.0078125, %v193_v37 }
  0xa7   :  { %v74_v45 = vpop.xlane.xlu0 %73  ;;  %v489_v55 = vmul.f32 %v459_v43, %v429_v38  ;;  %v462_v38 = vsub.f32 %v2676_v5, %v2948_v11  ;;  %v2482_v5 = vld [vmem:[%s3676_s5 + $0x88] sm:$0xff]  }
  0xa8   :  { %v2510_v46 = vpop.eup %2509  ;;  %v336_v48 = vmax.f32 %v306_v41, 0.0  ;;  %v307_v49 = vsub.f32 %v247_v42, %v277_v39  ;;  %v2968_v51 = vmul.f32 0.0078125, %v74_v45  ;;  %v2481_v41 = vld [vmem:[%s3676_s5 + $0x8] sm:$0xff]  }
  0xa9   :  { %v76_v53 = vpop.xlane.xlu1 %75  ;;  %v430_v54 = vmul.f32 %v2510_v46, %v2959_v29  ;;  %v526_v13 = vadd.f32 %v2976_v59, %v489_v55 }
  0xaa   :  { %v366_v60 = vadd.f32 1e-06, %v336_v48  ;;  %v337_v0 = vmax.f32 %v307_v49, 0.0  ;;  %v278_v40 = vmul.f32 %v2968_v51, %v2968_v51  ;;  %v2980_v2 = vmul.f32 0.0078125, %v76_v53  ;;  %v2483_v49 = vld [vmem:[%s3676_s5 + $0x50] sm:$0xff]  }
  0xab   :  { %v195_v7 = vpop.xlane.xlu0 %194  ;;  %v490_v10 = vmul.f32 %v460_v52, %v430_v54  ;;  %v2484_v54 = vld [vmem:[%s3676_s5 + $0xd0] sm:$0xff]  }
  0xac   :  { %2515 = vrsqrt.f32 %v366_v60  ;;  %v367_v1 = vadd.f32 1e-06, %v337_v0  ;;  %v248_v50 = vmul.f32 0.0078125, %v195_v7  ;;  %v279_v18 = vmul.f32 %v2980_v2, %v2980_v2 }
  0xad   :  { %v197_v12 = vpop.xlane.xlu1 %196  ;;  %v527_v14 = vadd.f32 %v2976_v59, %v490_v10 }
  0xae   :  { %v2512_v17 = vpop.eup %2511  ;;  %2517 = vrsqrt.f32 %v367_v1  ;;  %v308_v19 = vsub.f32 %v248_v50, %v278_v40  ;;  %v249_v22 = vmul.f32 0.0078125, %v197_v12  ;;  %v463_v50 = vsub.f32 %v2687_v8, %v2952_v24  ;;  %v2487_v8 = vld [vmem:[%s3676_s5 + $0x58] sm:$0xff]  }
  0xaf   :  { %v78_v26 = vpop.xlane.xlu0 %77  ;;  %v556_v27 = vpack.c.bf16 %v527_v14, %v526_v13  ;;  %v431_v28 = vmul.f32 %v2512_v17, %v2959_v29  ;;  %v2488_v24 = vld [vmem:[%s3676_s5 + $0xd8] sm:$0xff]  }
  0xb0   :  { %v2514_v33 = vpop.eup %2513  ;;  %v338_v34 = vmax.f32 %v308_v19, 0.0  ;;  %v309_v36 = vsub.f32 %v249_v22, %v279_v18  ;;  %v3001_v37 = vmul.f32 0.0078125, %v78_v26 }
  0xb1   :  { %915 = vmatmul.mubr.bf16.vlgmr.msra.gmra.mrb[0].mxu0 %v556_v27  ;;  %1098 = vmatmul.mubr.bf16.vlgmr.msra.gmra.mrb[0].mxu1 %v556_v27  ;;  %v80_v39 = vpop.xlane.xlu1 %79  ;;  %v432_v4 = vmul.f32 %v2514_v33, %v2959_v29  ;;  %v491_v63 = vmul.f32 %v461_v25, %v431_v28 }
  0xb2   :  { %v368_v42 = vadd.f32 1e-06, %v338_v34  ;;  %v339_v43 = vmax.f32 %v309_v36, 0.0  ;;  %v280_v45 = vmul.f32 %v3001_v37, %v3001_v37  ;;  %924 = vmatprep.mubr.bf16.mxu0 %v2611_v58  ;;  %1107 = vmatprep.mubr.bf16.mxu1 %v2611_v58  ;;  %v3016_v11 = vmul.f32 0.0078125, %v80_v39 }
  0xb3   :  { %v199_v46 = vpop.xlane.xlu0 %198  ;;  %v492_v48 = vmul.f32 %v462_v38, %v432_v4  ;;  %2215 = vmatpush3.bf16.msra.mxu0 %v2477_v15  ;;  %2321 = vmatpush3.bf16.msra.mxu1 %v2478_v16  ;;  %v528_v60 = vadd.f32 %v2976_v59, %v491_v63  ;;  %v2485_v15 = vld [vmem:[%s3676_s5 + $0x10] sm:$0xff]   ;;  %v2491_v63 = vld [vmem:[%s3676_s5 + $0x60] sm:$0xff]  }
  0xb4   :  { %2519 = vrsqrt.f32 %v368_v42  ;;  %v369_v52 = vadd.f32 1e-06, %v339_v43  ;;  %v250_v53 = vmul.f32 0.0078125, %v199_v46  ;;  %2216 = vmatprep.subr.bf16.mxu0 %v2479_v23  ;;  %2322 = vmatprep.subr.bf16.mxu1 %v2480_v31  ;;  %v281_v7 = vmul.f32 %v3016_v11, %v3016_v11  ;;  %v2486_v16 = vld [vmem:[%s3676_s5 + $0x90] sm:$0xff]  }
  0xb5   :  { %v201_v55 = vpop.xlane.xlu1 %200  ;;  %v529_v0 = vadd.f32 %v2976_v59, %v492_v48  ;;  %v464_v23 = vsub.f32 %v2692_v9, %v2961_v30  ;;  %v2489_v9 = vld [vmem:[%s3676_s5 + $0x18] sm:$0xff]  }
  0xb6   :  { %v2516_v40 = vpop.eup %2515  ;;  %2521 = vrsqrt.f32 %v369_v52  ;;  %v310_v10 = vsub.f32 %v250_v53, %v280_v45  ;;  %v251_v1 = vmul.f32 0.0078125, %v201_v55  ;;  %v2490_v30 = vld [vmem:[%s3676_s5 + $0x98] sm:$0xff]   ;;  %v465_v52 = vsub.f32 %v2727_v20, %v2968_v51  ;;  %v2495_v20 = vld [vmem:[%s3676_s5 + $0x68] sm:$0xff]  }
  0xb7   :  { %v82_v12 = vpop.xlane.xlu0 %81  ;;  %v557_v13 = vpack.c.bf16 %v529_v0, %v528_v60  ;;  %v433_v14 = vmul.f32 %v2516_v40, %v2959_v29  ;;  %2217 = vmatpush3.bf16.msra.mxu0 %v2481_v41  ;;  %2323 = vmatpush3.bf16.msra.mxu1 %v2482_v5  ;;  %v2492_v41 = vld [vmem:[%s3676_s5 + $0xe0] sm:$0xff]   ;;  %v2496_v51 = vld [vmem:[%s3676_s5 + $0xe8] sm:$0xff]  }
  0xb8   :  { %v2518_v17 = vpop.eup %2517  ;;  %v340_v18 = vmax.f32 %v310_v10, 0.0  ;;  %v311_v19 = vsub.f32 %v251_v1, %v281_v7  ;;  %v3037_v22 = vmul.f32 0.0078125, %v82_v12  ;;  %2218 = vmatprep.subr.bf16.mxu0 %v2483_v49  ;;  %2324 = vmatprep.subr.bf16.mxu1 %v2484_v54  ;;  %v2493_v60 = vld [vmem:[%s3676_s5 + $0x20] sm:$0xff]  }
  0xb9   :  { %925 = vmatmul.mubr.bf16.gmra.mrb[4].mxu0 %v557_v13  ;;  %1108 = vmatmul.mubr.bf16.gmra.mrb[4].mxu1 %v557_v13  ;;  %v84_v25 = vpop.xlane.xlu1 %83  ;;  %v434_v26 = vmul.f32 %v2518_v17, %v2959_v29  ;;  %v493_v27 = vmul.f32 %v463_v50, %v433_v14  ;;  %v2494_v0 = vld [vmem:[%s3676_s5 + $0xa0] sm:$0xff]   ;;  %v466_v50 = vsub.f32 %v2732_v21, %v2980_v2  ;;  %v2497_v21 = vld [vmem:[%s3676_s5 + $0x28] sm:$0xff]  }
  0xba   :  { %v370_v28 = vadd.f32 1e-06, %v340_v18  ;;  %v341_v31 = vmax.f32 %v311_v19, 0.0  ;;  %v282_v33 = vmul.f32 %v3037_v22, %v3037_v22  ;;  %934 = vmatprep.mubr.bf16.mxu0 %v2611_v58  ;;  %1117 = vmatprep.mubr.bf16.mxu1 %v2611_v58  ;;  %v3052_v34 = vmul.f32 0.0078125, %v84_v25  ;;  %v2498_v2 = vld [vmem:[%s3676_s5 + $0xa8] sm:$0xff]   ;;  %v2499_v25 = vld [vmem:[%s3676_s5 + $0x70] sm:$0xff]  }
  0xbb   :  { %v203_v36 = vpop.xlane.xlu0 %202  ;;  %v494_v38 = vmul.f32 %v464_v23, %v434_v26  ;;  %2219 = vmatpush3.bf16.msra.mxu0 %v2485_v15  ;;  %2325 = vmatpush3.bf16.msra.mxu1 %v2486_v16  ;;  %v530_v43 = vadd.f32 %v2976_v59, %v493_v27  ;;  %v2500_v26 = vld [vmem:[%s3676_s5 + $0xf0] sm:$0xff]  }
  0xbc   :  { %2523 = vrsqrt.f32 %v370_v28  ;;  %v371_v39 = vadd.f32 1e-06, %v341_v31  ;;  %v252_v4 = vmul.f32 0.0078125, %v203_v36  ;;  %2220 = vmatprep.subr.bf16.mxu0 %v2487_v8  ;;  %2326 = vmatprep.subr.bf16.mxu1 %v2488_v24  ;;  %v283_v46 = vmul.f32 %v3052_v34, %v3052_v34 }
  0xbd   :  { %v205_v42 = vpop.xlane.xlu1 %204  ;;  %v531_v45 = vadd.f32 %v2976_v59, %v494_v38 }
  0xbe   :  { %v2520_v5 = vpop.eup %2519  ;;  %2525 = vrsqrt.f32 %v371_v39  ;;  %v312_v48 = vsub.f32 %v252_v4, %v282_v33  ;;  %v253_v49 = vmul.f32 0.0078125, %v205_v42  ;;  %v2502_v42 = vld [vmem:[%s3676_s5 + $0xb0] sm:$0xff]  }
  0xbf   :  { %v86_v53 = vpop.xlane.xlu0 %85  ;;  %v558_v54 = vpack.c.bf16 %v531_v45, %v530_v43  ;;  %v435_v55 = vmul.f32 %v2520_v5, %v2959_v29  ;;  %2221 = vmatpush3.bf16.msra.mxu0 %v2489_v9  ;;  %2327 = vmatpush3.bf16.msra.mxu1 %v2490_v30  ;;  %v467_v30 = vsub.f32 %v2767_v32, %v3001_v37  ;;  %v2503_v32 = vld [vmem:[%s3676_s5 + $0x78] sm:$0xff]  }
  0xc0   :  { %v2522_v40 = vpop.eup %2521  ;;  %v342_v7 = vmax.f32 %v312_v48, 0.0  ;;  %v313_v10 = vsub.f32 %v253_v49, %v283_v46  ;;  %v3079_v1 = vmul.f32 0.0078125, %v86_v53  ;;  %2222 = vmatprep.subr.bf16.mxu0 %v2491_v63  ;;  %2328 = vmatprep.subr.bf16.mxu1 %v2492_v41  ;;  %v2501_v41 = vld [vmem:[%s3676_s5 + $0x30] sm:$0xff]   ;;  %v2504_v37 = vld [vmem:[%s3676_s5 + $0xf8] sm:$0xff]   ;;  %v468_v48 = vsub.f32 %v2778_v35, %v3016_v11 }
  0xc1   :  { %935 = vmatmul.mubr.bf16.gmra.mrb[8].mxu0 %v558_v54  ;;  %1118 = vmatmul.mubr.bf16.gmra.mrb[8].mxu1 %v558_v54  ;;  %v88_v12 = vpop.xlane.xlu1 %87  ;;  %v436_v13 = vmul.f32 %v2522_v40, %v2959_v29  ;;  %v495_v14 = vmul.f32 %v465_v52, %v435_v55  ;;  %v2505_v35 = vld [vmem:[%s3676_s5 + $0x38] sm:$0xff]  }
  0xc2   :  { %v372_v15 = vadd.f32 1e-06, %v342_v7  ;;  %v343_v16 = vmax.f32 %v313_v10, 0.0  ;;  %v284_v17 = vmul.f32 %v3079_v1, %v3079_v1  ;;  %944 = vmatprep.mubr.bf16.mxu0 %v2611_v58  ;;  %1127 = vmatprep.mubr.bf16.mxu1 %v2611_v58  ;;  %v3094_v18 = vmul.f32 0.0078125, %v88_v12  ;;  %v2506_v11 = vld [vmem:[%s3676_s5 + $0xb8] sm:$0xff]  }
  0xc3   :  { %v207_v19 = vpop.xlane.xlu0 %206  ;;  %v496_v8 = vmul.f32 %v466_v50, %v436_v13  ;;  %2223 = vmatpush3.bf16.msra.mxu0 %v2493_v60  ;;  %2329 = vmatpush3.bf16.msra.mxu1 %v2494_v0  ;;  %v532_v28 = vadd.f32 %v2976_v59, %v495_v14 }
  0xc4   :  { %2527 = vrsqrt.f32 %v372_v15  ;;  %v373_v24 = vadd.f32 1e-06, %v343_v16  ;;  %v254_v23 = vmul.f32 0.0078125, %v207_v19  ;;  %2224 = vmatprep.subr.bf16.mxu0 %v2495_v20  ;;  %2330 = vmatprep.subr.bf16.mxu1 %v2496_v51  ;;  %v285_v36 = vmul.f32 %v3094_v18, %v3094_v18 }
  0xc5   :  { %v209_v27 = vpop.xlane.xlu1 %208  ;;  %v533_v31 = vadd.f32 %v2976_v59, %v496_v8 }
  0xc6   :  { %v2524_v33 = vpop.eup %2523  ;;  %2529 = vrsqrt.f32 %v373_v24  ;;  %v314_v38 = vsub.f32 %v254_v23, %v284_v17  ;;  %v255_v9 = vmul.f32 0.0078125, %v209_v27  ;;  %v469_v17 = vsub.f32 %v2807_v44, %v3037_v22 }
  0xc7   :  { %v90_v39 = vpop.xlane.xlu0 %89  ;;  %v559_v4 = vpack.c.bf16 %v533_v31, %v532_v28  ;;  %v437_v63 = vmul.f32 %v2524_v33, %v2959_v29  ;;  %2225 = vmatpush3.bf16.msra.mxu0 %v2497_v21  ;;  %2331 = vmatpush3.bf16.msra.mxu1 %v2498_v2 }
  0xc8   :  { %v2526_v43 = vpop.eup %2525  ;;  %v344_v45 = vmax.f32 %v314_v38, 0.0  ;;  %v315_v5 = vsub.f32 %v255_v9, %v285_v36  ;;  %v3121_v46 = vmul.f32 0.0078125, %v90_v39  ;;  %2226 = vmatprep.subr.bf16.mxu0 %v2499_v25  ;;  %2332 = vmatprep.subr.bf16.mxu1 %v2500_v26  ;;  %v470_v26 = vsub.f32 %v2818_v47, %v3052_v34 }
  0xc9   :  { %945 = vmatmul.mubr.bf16.gmra.mrb[12].mxu0 %v559_v4  ;;  %1128 = vmatmul.mubr.bf16.gmra.mrb[12].mxu1 %v559_v4  ;;  %v92_v49 = vpop.xlane.xlu1 %91  ;;  %v438_v52 = vmul.f32 %v2526_v43, %v2959_v29  ;;  %v497_v53 = vmul.f32 %v467_v30, %v437_v63 }
  0xca   :  { %v374_v54 = vadd.f32 1e-06, %v344_v45  ;;  %v345_v55 = vmax.f32 %v315_v5, 0.0  ;;  %v286_v60 = vmul.f32 %v3121_v46, %v3121_v46  ;;  %954 = vmatprep.mubr.bf16.mxu0 %v2611_v58  ;;  %1137 = vmatprep.mubr.bf16.mxu1 %v2611_v58  ;;  %v3136_v0 = vmul.f32 0.0078125, %v92_v49 }
  0xcb   :  { %v211_v40 = vpop.xlane.xlu0 %210  ;;  %v498_v7 = vmul.f32 %v468_v48, %v438_v52  ;;  %2227 = vmatpush3.bf16.msra.mxu0 %v2501_v41  ;;  %2333 = vmatpush3.bf16.msra.mxu1 %v2502_v42  ;;  %v534_v50 = vadd.f32 %v2976_v59, %v497_v53  ;;  %v471_v45 = vsub.f32 %v2847_v56, %v3079_v1 }
  0xcc   :  { %2531 = vrsqrt.f32 %v374_v54  ;;  %v375_v10 = vadd.f32 1e-06, %v345_v55  ;;  %v256_v20 = vmul.f32 0.0078125, %v211_v40  ;;  %2228 = vmatprep.subr.bf16.mxu0 %v2503_v32  ;;  %2334 = vmatprep.subr.bf16.mxu1 %v2504_v37  ;;  %v287_v14 = vmul.f32 %v3136_v0, %v3136_v0 }
  0xcd   :  { %v213_v51 = vpop.xlane.xlu1 %212  ;;  %v535_v12 = vadd.f32 %v2976_v59, %v498_v7  ;;  %v472_v54 = vsub.f32 %v2852_v57, %v3094_v18 }
  0xce   :  { %v2528_v13 = vpop.eup %2527  ;;  %2533 = vrsqrt.f32 %v375_v10  ;;  %v316_v15 = vsub.f32 %v256_v20, %v286_v60  ;;  %v257_v16 = vmul.f32 0.0078125, %v213_v51 }
  0xcf   :  { %v94_v19 = vpop.xlane.xlu0 %93  ;;  %v560_v8 = vpack.c.bf16 %v535_v12, %v534_v50  ;;  %v439_v21 = vmul.f32 %v2528_v13, %v2959_v29  ;;  %2229 = vmatpush3.bf16.msra.mxu0 %v2505_v35  ;;  %2335 = vmatpush3.bf16.msra.mxu1 %v2506_v11 }
  0xd0   :  { %v2530_v2 = vpop.eup %2529  ;;  %v346_v24 = vmax.f32 %v316_v15, 0.0  ;;  %v317_v23 = vsub.f32 %v257_v16, %v287_v14  ;;  %v3151_v25 = vmul.f32 0.0078125, %v94_v19  ;;  %v473_v16 = vsub.f32 %v2865_v61, %v3121_v46 }
  0xd1   :  { %955 = vmatmul.mubr.bf16.gmra.mrb[16].mxu0 %v560_v8  ;;  %1138 = vmatmul.mubr.bf16.gmra.mrb[16].mxu1 %v560_v8  ;;  %v96_v27 = vpop.xlane.xlu1 %95  ;;  %v440_v28 = vmul.f32 %v2530_v2, %v2959_v29  ;;  %v499_v44 = vmul.f32 %v469_v17, %v439_v21 }
  0xd2   :  { %v376_v22 = vadd.f32 1e-06, %v346_v24  ;;  %v347_v31 = vmax.f32 %v317_v23, 0.0  ;;  %v288_v33 = vmul.f32 %v3151_v25, %v3151_v25  ;;  %964 = vmatprep.mubr.bf16.mxu0 %v2611_v58  ;;  %1147 = vmatprep.mubr.bf16.mxu1 %v2611_v58  ;;  %v3160_v36 = vmul.f32 0.0078125, %v96_v27 }
  0xd3   :  { %v215_v38 = vpop.xlane.xlu0 %214  ;;  %v500_v9 = vmul.f32 %v470_v26, %v440_v28  ;;  %v536_v39 = vadd.f32 %v2976_v59, %v499_v44  ;;  %v474_v26 = vsub.f32 %v2870_v62, %v3136_v0 }
  0xd4   :  { %2535 = vrsqrt.f32 %v376_v22  ;;  %v377_v47 = vadd.f32 1e-06, %v347_v31  ;;  %v258_v34 = vmul.f32 0.0078125, %v215_v38  ;;  %v289_v41 = vmul.f32 %v3160_v36, %v3160_v36 }
  0xd5   :  { %v217_v30 = vpop.xlane.xlu1 %216  ;;  %v537_v4 = vadd.f32 %v2976_v59, %v500_v9 }
  0xd6   :  { %v2532_v63 = vpop.eup %2531  ;;  %2537 = vrsqrt.f32 %v377_v47  ;;  %v318_v42 = vsub.f32 %v258_v34, %v288_v33  ;;  %v259_v43 = vmul.f32 0.0078125, %v217_v30 }
  0xd7   :  { %v98_v5 = vpop.xlane.xlu0 %97  ;;  %v561_v32 = vpack.c.bf16 %v537_v4, %v536_v39  ;;  %v441_v37 = vmul.f32 %v2532_v63, %v2959_v29 }
  0xd8   :  { %v2534_v48 = vpop.eup %2533  ;;  %v348_v49 = vmax.f32 %v318_v42, 0.0  ;;  %v319_v52 = vsub.f32 %v259_v43, %v289_v41  ;;  %v3169_v53 = vmul.f32 0.0078125, %v98_v5  ;;  %v475_v41 = vsub.f32 %v2881_v3, %v3151_v25 }
  0xd9   :  { %965 = vmatmul.mubr.bf16.gmra.mrb[20].mxu0 %v561_v32  ;;  %1148 = vmatmul.mubr.bf16.gmra.mrb[20].mxu1 %v561_v32  ;;  %v100_v55 = vpop.xlane.xlu1 %99  ;;  %v442_v60 = vmul.f32 %v2534_v48, %v2959_v29  ;;  %v501_v40 = vmul.f32 %v471_v45, %v441_v37 }
  0xda   :  { %v378_v7 = vadd.f32 1e-06, %v348_v49  ;;  %v349_v56 = vmax.f32 %v319_v52, 0.0  ;;  %v290_v1 = vmul.f32 %v3169_v53, %v3169_v53  ;;  %974 = vmatprep.mubr.bf16.mxu0 %v2611_v58  ;;  %1157 = vmatprep.mubr.bf16.mxu1 %v2611_v58  ;;  %v3178_v35 = vmul.f32 0.0078125, %v100_v55 }
  0xdb   :  { %v219_v11 = vpop.xlane.xlu0 %218  ;;  %v502_v10 = vmul.f32 %v472_v54, %v442_v60  ;;  %v538_v51 = vadd.f32 %v2976_v59, %v501_v40  ;;  %v476_v49 = vsub.f32 %v2886_v6, %v3160_v36 }
  0xdc   :  { %2539 = vrsqrt.f32 %v378_v7  ;;  %v379_v57 = vadd.f32 1e-06, %v349_v56  ;;  %v260_v18 = vmul.f32 0.0078125, %v219_v11  ;;  %v291_v13 = vmul.f32 %v3178_v35, %v3178_v35 }
  0xdd   :  { %v221_v20 = vpop.xlane.xlu1 %220  ;;  %v539_v50 = vadd.f32 %v2976_v59, %v502_v10 }
  0xde   :  { %v2536_v12 = vpop.eup %2535  ;;  %2541 = vrsqrt.f32 %v379_v57  ;;  %v320_v14 = vsub.f32 %v260_v18, %v290_v1  ;;  %v261_v15 = vmul.f32 0.0078125, %v221_v20 }
  0xdf   :  { %v102_v17 = vpop.xlane.xlu0 %101  ;;  %v562_v19 = vpack.c.bf16 %v539_v50, %v538_v51  ;;  %v443_v8 = vmul.f32 %v2536_v12, %v2959_v29  ;;  %v2567_v50 = vld [vmem:[%s3674_s0 + $0x90] sm:$0xff] }
  0xe0   :  { %v2538_v21 = vpop.eup %2537  ;;  %v350_v2 = vmax.f32 %v320_v14, 0.0  ;;  %v321_v24 = vsub.f32 %v261_v15, %v291_v13  ;;  %v3187_v23 = vmul.f32 0.0078125, %v102_v17  ;;  %v477_v12 = vsub.f32 %v2567_v50, %v3169_v53 }
  0xe1   :  { %975 = vmatmul.mubr.bf16.gmra.mrb[24].mxu0 %v562_v19  ;;  %1158 = vmatmul.mubr.bf16.gmra.mrb[24].mxu1 %v562_v19  ;;  %v104_v27 = vpop.xlane.xlu1 %103  ;;  %v444_v28 = vmul.f32 %v2538_v21, %v2959_v29  ;;  %v503_v44 = vmul.f32 %v473_v16, %v443_v8  ;;  %v2568_v21 = vld [vmem:[%s3674_s0 + $0x98] sm:$0xff] }
  0xe2   :  { %v380_v22 = vadd.f32 1e-06, %v350_v2  ;;  %v351_v61 = vmax.f32 %v321_v24, 0.0  ;;  %v292_v46 = vmul.f32 %v3187_v23, %v3187_v23  ;;  %984 = vmatprep.mubr.bf16.mxu0 %v2611_v58  ;;  %1167 = vmatprep.mubr.bf16.mxu1 %v2611_v58  ;;  %v3196_v31 = vmul.f32 0.0078125, %v104_v27 }
  0xe3   :  { %v223_v33 = vpop.xlane.xlu0 %222  ;;  %v504_v38 = vmul.f32 %v474_v26, %v444_v28  ;;  %v540_v47 = vadd.f32 %v2976_v59, %v503_v44  ;;  %v478_v2 = vsub.f32 %v2568_v21, %v3178_v35  ;;  %v2572_v21 = vld [vmem:[%s3674_s0 + $0xb8] sm:$0xff] }
  0xe4   :  { %2543 = vrsqrt.f32 %v380_v22  ;;  %v381_v62 = vadd.f32 1e-06, %v351_v61  ;;  %v262_v0 = vmul.f32 0.0078125, %v223_v33  ;;  %v293_v39 = vmul.f32 %v3196_v31, %v3196_v31 }
  0xe5   :  { %v225_v9 = vpop.xlane.xlu1 %224  ;;  %v541_v34 = vadd.f32 %v2976_v59, %v504_v38 }
  0xe6   :  { %v2540_v30 = vpop.eup %2539  ;;  %2545 = vrsqrt.f32 %v381_v62  ;;  %v322_v4 = vsub.f32 %v262_v0, %v292_v46  ;;  %v263_v63 = vmul.f32 0.0078125, %v225_v9 }
  0xe7   :  { %v106_v42 = vpop.xlane.xlu0 %105  ;;  %v563_v43 = vpack.c.bf16 %v541_v34, %v540_v47  ;;  %v445_v45 = vmul.f32 %v2540_v30, %v2959_v29 }
  0xe8   :  { %v2542_v5 = vpop.eup %2541  ;;  %v352_v32 = vmax.f32 %v322_v4, 0.0  ;;  %v323_v37 = vsub.f32 %v263_v63, %v293_v39  ;;  %v3205_v48 = vmul.f32 0.0078125, %v106_v42  ;;  %v2569_v39 = vld [vmem:[%s3674_s0 + $0xa0] sm:$0xff] }
  0xe9   :  { %985 = vmatmul.mubr.bf16.gmra.mrb[28].mxu0 %v563_v43  ;;  %1168 = vmatmul.mubr.bf16.gmra.mrb[28].mxu1 %v563_v43  ;;  %v108_v52 = vpop.xlane.xlu1 %107  ;;  %v446_v54 = vmul.f32 %v2542_v5, %v2959_v29  ;;  %v505_v55 = vmul.f32 %v475_v41, %v445_v45  ;;  %v479_v4 = vsub.f32 %v2569_v39, %v3187_v23 }
  0xea   :  { %v382_v60 = vadd.f32 1e-06, %v352_v32  ;;  %v353_v3 = vmax.f32 %v323_v37, 0.0  ;;  %v294_v25 = vmul.f32 %v3205_v48, %v3205_v48  ;;  %994 = vmatprep.mubr.bf16.mxu0 %v2611_v58  ;;  %1177 = vmatprep.mubr.bf16.mxu1 %v2611_v58  ;;  %v3214_v40 = vmul.f32 0.0078125, %v108_v52  ;;  %v2570_v37 = vld [vmem:[%s3674_s0 + $0xa8] sm:$0xff] }
  0xeb   :  { %v227_v7 = vpop.xlane.xlu0 %226  ;;  %v506_v56 = vmul.f32 %v476_v49, %v446_v54  ;;  %v542_v11 = vadd.f32 %v2976_v59, %v505_v55  ;;  %v480_v49 = vsub.f32 %v2570_v37, %v3196_v31 }
  0xec   :  { %2547 = vrsqrt.f32 %v382_v60  ;;  %v383_v6 = vadd.f32 1e-06, %v353_v3  ;;  %v264_v36 = vmul.f32 0.0078125, %v227_v7  ;;  %v295_v18 = vmul.f32 %v3214_v40, %v3214_v40 }
  0xed   :  { %v229_v1 = vpop.xlane.xlu1 %228  ;;  %v543_v10 = vadd.f32 %v2976_v59, %v506_v56 }
  0xee   :  { %v2544_v57 = vpop.eup %2543  ;;  %2549 = vrsqrt.f32 %v383_v6  ;;  %v324_v20 = vsub.f32 %v264_v36, %v294_v25  ;;  %v265_v51 = vmul.f32 0.0078125, %v229_v1 }
  0xef   :  { %v110_v13 = vpop.xlane.xlu0 %109  ;;  %v564_v14 = vpack.c.bf16 %v543_v10, %v542_v11  ;;  %v447_v15 = vmul.f32 %v2544_v57, %v2959_v29 }
  0xf0   :  { %v2546_v16 = vpop.eup %2545  ;;  %v354_v17 = vmax.f32 %v324_v20, 0.0  ;;  %v325_v19 = vsub.f32 %v265_v51, %v295_v18  ;;  %v3225_v8 = vmul.f32 0.0078125, %v110_v13  ;;  %v2571_v51 = vld [vmem:[%s3674_s0 + $0xb0] sm:$0xff] }
  0xf1   :  { %995 = vmatmul.mubr.bf16.gmra.mrb[32].mxu0 %v564_v14  ;;  %1178 = vmatmul.mubr.bf16.gmra.mrb[32].mxu1 %v564_v14  ;;  %v112_v24 = vpop.xlane.xlu1 %111  ;;  %v448_v53 = vmul.f32 %v2546_v16, %v2959_v29  ;;  %v507_v26 = vmul.f32 %v477_v12, %v447_v15  ;;  %v481_v50 = vsub.f32 %v2571_v51, %v3205_v48  ;;  %v2578_v51 = vld [vmem:[%s3674_s0 + $0xe0] sm:$0xff] }
  0xf2   :  { %v384_v27 = vadd.f32 1e-06, %v354_v17  ;;  %v355_v28 = vmax.f32 %v325_v19, 0.0  ;;  %v296_v44 = vmul.f32 %v3225_v8, %v3225_v8  ;;  %1004 = vmatprep.mubr.bf16.mxu0 %v2611_v58  ;;  %1187 = vmatprep.mubr.bf16.mxu1 %v2611_v58  ;;  %v3236_v22 = vmul.f32 0.0078125, %v112_v24 }
  0xf3   :  { %v231_v61 = vpop.xlane.xlu0 %230  ;;  %v508_v46 = vmul.f32 %v478_v2, %v448_v53  ;;  %v544_v62 = vadd.f32 %v2976_v59, %v507_v26  ;;  %v482_v2 = vsub.f32 %v2572_v21, %v3214_v40 }
  0xf4   :  { %2551 = vrsqrt.f32 %v384_v27  ;;  %v385_v35 = vadd.f32 1e-06, %v355_v28  ;;  %v266_v33 = vmul.f32 0.0078125, %v231_v61  ;;  %v297_v47 = vmul.f32 %v3236_v22, %v3236_v22 }
  0xf5   :  { %v233_v38 = vpop.xlane.xlu1 %232  ;;  %v545_v0 = vadd.f32 %v2976_v59, %v508_v46 }
  0xf6   :  { %v2548_v9 = vpop.eup %2547  ;;  %2553 = vrsqrt.f32 %v385_v35  ;;  %v326_v34 = vsub.f32 %v266_v33, %v296_v44  ;;  %v267_v30 = vmul.f32 0.0078125, %v233_v38 }
  0xf7   :  { %v114_v63 = vpop.xlane.xlu0 %113  ;;  %v565_v41 = vpack.c.bf16 %v545_v0, %v544_v62  ;;  %v449_v42 = vmul.f32 %v2548_v9, %v2959_v29 }
  0xf8   :  { %v2550_v43 = vpop.eup %2549  ;;  %v356_v45 = vmax.f32 %v326_v34, 0.0  ;;  %v327_v5 = vsub.f32 %v267_v30, %v297_v47  ;;  %v3247_v32 = vmul.f32 0.0078125, %v114_v63  ;;  %v2573_v30 = vld [vmem:[%s3674_s0 + $0xc0] sm:$0xff] }
  0xf9   :  { %1005 = vmatmul.mubr.bf16.gmra.mrb[36].mxu0 %v565_v41  ;;  %1188 = vmatmul.mubr.bf16.gmra.mrb[36].mxu1 %v565_v41  ;;  %v116_v52 = vpop.xlane.xlu1 %115  ;;  %v450_v23 = vmul.f32 %v2550_v43, %v2959_v29  ;;  %v509_v54 = vmul.f32 %v479_v4, %v449_v42  ;;  %v483_v39 = vsub.f32 %v2573_v30, %v3225_v8 }
  0xfa   :  { %v386_v55 = vadd.f32 1e-06, %v356_v45  ;;  %v357_v60 = vmax.f32 %v327_v5, 0.0  ;;  %v298_v3 = vmul.f32 %v3247_v32, %v3247_v32  ;;  %1014 = vmatprep.mubr.bf16.mxu0 %v2611_v58  ;;  %1197 = vmatprep.mubr.bf16.mxu1 %v2611_v58  ;;  %v3258_v25 = vmul.f32 0.0078125, %v116_v52  ;;  %v2574_v45 = vld [vmem:[%s3674_s0 + $0xc8] sm:$0xff] }
  0xfb   :  { %v235_v7 = vpop.xlane.xlu0 %234  ;;  %v510_v56 = vmul.f32 %v480_v49, %v450_v23  ;;  %v546_v1 = vadd.f32 %v2976_v59, %v509_v54  ;;  %v484_v5 = vsub.f32 %v2574_v45, %v3236_v22 }
  0xfc   :  { %2555 = vrsqrt.f32 %v386_v55  ;;  %v387_v31 = vadd.f32 1e-06, %v357_v60  ;;  %v268_v6 = vmul.f32 0.0078125, %v235_v7  ;;  %v299_v57 = vmul.f32 %v3258_v25, %v3258_v25 }
  0xfd   :  { %v237_v36 = vpop.xlane.xlu1 %236  ;;  %v547_v11 = vadd.f32 %v2976_v59, %v510_v56  ;;  %v2576_v56 = vld [vmem:[%s3677_s1] ss:$0 sm:$0xff] }
  0xfe   :  { %v2552_v10 = vpop.eup %2551  ;;  %2557 = vrsqrt.f32 %v387_v31  ;;  %v328_v18 = vsub.f32 %v268_v6, %v298_v3  ;;  %v269_v20 = vmul.f32 0.0078125, %v237_v36  ;;  %v2577_v36 = vld [vmem:[%s3674_s0 + $0xd8] sm:$0xff] }
  0xff   :  { %v118_v12 = vpop.xlane.xlu0 %117  ;;  %v566_v13 = vpack.c.bf16 %v547_v11, %v546_v1  ;;  %v451_v14 = vmul.f32 %v2552_v10, %v2959_v29  ;;  %v486_v1 = vsub.f32 %v2577_v36, %v3258_v25 }
 0x100   :  { %v2554_v15 = vpop.eup %2553  ;;  %v358_v16 = vmax.f32 %v328_v18, 0.0  ;;  %v329_v17 = vsub.f32 %v269_v20, %v299_v57  ;;  %v3269_v19 = vmul.f32 0.0078125, %v118_v12 }
 0x101   :  { %1015 = vmatmul.mubr.bf16.gmra.mrb[40].mxu0 %v566_v13  ;;  %1198 = vmatmul.mubr.bf16.gmra.mrb[40].mxu1 %v566_v13  ;;  %v120_v24 = vpop.xlane.xlu1 %119  ;;  %v452_v48 = vmul.f32 %v2554_v15, %v2959_v29  ;;  %v511_v53 = vmul.f32 %v481_v50, %v451_v14  ;;  %v2579_v14 = vld [vmem:[%s3674_s0 + $0xe8] sm:$0xff] }
 0x102   :  { %v388_v26 = vadd.f32 1e-06, %v358_v16  ;;  %v359_v27 = vmax.f32 %v329_v17, 0.0  ;;  %v300_v28 = vmul.f32 %v3269_v19, %v3269_v19  ;;  %1024 = vmatprep.mubr.bf16.mxu0 %v2611_v58  ;;  %1207 = vmatprep.mubr.bf16.mxu1 %v2611_v58  ;;  %v3280_v44 = vmul.f32 0.0078125, %v120_v24 }
 0x103   :  { %v239_v61 = vpop.xlane.xlu0 %238  ;;  %v512_v46 = vmul.f32 %v482_v2, %v452_v48  ;;  %v548_v38 = vadd.f32 %v2976_v59, %v511_v53  ;;  %v487_v25 = vsub.f32 %v2578_v51, %v3269_v19  ;;  %v2580_v19 = vld [vmem:[%s3678_s2] ss:$0 sm:$0xff]  ;;  %v702_v48 = vlaneseq }
 0x104   :  { %2559 = vrsqrt.f32 %v388_v26  ;;  %v389_v40 = vadd.f32 1e-06, %v359_v27  ;;  %v270_v35 = vmul.f32 0.0078125, %v239_v61  ;;  %v301_v9 = vmul.f32 %v3280_v44, %v3280_v44 }
 0x105   :  { %v241_v33 = vpop.xlane.xlu1 %240  ;;  %v549_v62 = vadd.f32 %v2976_v59, %v512_v46  ;;  %v488_v15 = vsub.f32 %v2579_v14, %v3280_v44  ;;  %v703_v53 = vshrl.u32 %v702_v48, 7 }
 0x106   :  { %v2556_v0 = vpop.eup %2555  ;;  %2561 = vrsqrt.f32 %v389_v40  ;;  %v330_v47 = vsub.f32 %v270_v35, %v300_v28  ;;  %v271_v34 = vmul.f32 0.0078125, %v241_v33  ;;  %v700_v28 = vld [vmem:[%s3679_s4] sm:$0xf] }
 0x107   :  { %v567_v4 = vpack.c.bf16 %v549_v62, %v548_v38  ;;  %v453_v63 = vmul.f32 %v2556_v0, %v2959_v29  ;;  %v704_v26 = vsub.s32 0, %v703_v53  ;;  %v712_v27 = vsub.s32 2, %v703_v53 }
 0x108   :  { %v2558_v41 = vpop.eup %2557  ;;  %v360_v42 = vmax.f32 %v330_v47, 0.0  ;;  %v331_v43 = vsub.f32 %v271_v34, %v301_v9  ;;  %v708_v44 = vsub.s32 1, %v703_v53 }
 0x109   :  { %1025 = vmatmul.mubr.bf16.gmra.mrb[44].mxu0 %v567_v4  ;;  %1208 = vmatmul.mubr.bf16.gmra.mrb[44].mxu1 %v567_v4  ;;  %v454_v37 = vmul.f32 %v2558_v41, %v2959_v29  ;;  %v513_v49 = vmul.f32 %v483_v39, %v453_v63  ;;  %v2575_v29 = vld [vmem:[%s3674_s0 + $0xd0] sm:$0xff]  ;;  %v3331_v61 = vrot.slane %v700_v28, %v704_v26 }
 0x10a   :  { %v390_v52 = vadd.f32 1e-06, %v360_v42  ;;  %v361_v23 = vmax.f32 %v331_v43, 0.0  ;;  %1034 = vmatprep.mubr.bf16.mxu0 %v2611_v58  ;;  %1217 = vmatprep.mubr.bf16.mxu1 %v2611_v58  ;;  %v485_v22 = vsub.f32 %v2575_v29, %v3247_v32  ;;  %v3333_v46 = vrot.slane %v700_v28, %v712_v27 }
 0x10b   :  { %v514_v8 = vmul.f32 %v484_v5, %v454_v37  ;;  %v550_v55 = vadd.f32 %v2976_v59, %v513_v49  ;;  %v3335_v40 = vrot.slane %v700_v28, %v708_v44 }
 0x10c   :  { %2563 = vrsqrt.f32 %v390_v52  ;;  %v391_v54 = vadd.f32 1e-06, %v361_v23 }
 0x10d   :  { %v551_v60 = vadd.f32 %v2976_v59, %v514_v8 }
 0x10e   :  { %v2560_v3 = vpop.eup %2559  ;;  %2565 = vrsqrt.f32 %v391_v54 }
 0x10f   :  { %v568_v7 = vpack.c.bf16 %v551_v60, %v550_v55  ;;  %v455_v31 = vmul.f32 %v2576_v56, %v2560_v3 }
 0x110   :  { %v2562_v6 = vpop.eup %2561 }
 0x111   :  { %1035 = vmatmul.mubr.bf16.gmra.mrb[48].mxu0 %v568_v7  ;;  %1218 = vmatmul.mubr.bf16.gmra.mrb[48].mxu1 %v568_v7  ;;  %v456_v11 = vmul.f32 %v2576_v56, %v2562_v6  ;;  %v515_v10 = vmul.f32 %v485_v22, %v455_v31 }
 0x112   :  { %1044 = vmatprep.mubr.bf16.mxu0 %v2611_v58  ;;  %1227 = vmatprep.mubr.bf16.mxu1 %v2611_v58 }
 0x113   :  { %v516_v32 = vmul.f32 %v486_v1, %v456_v11  ;;  %v552_v57 = vadd.f32 %v2976_v59, %v515_v10 }
 0x115   :  { %v553_v18 = vadd.f32 %v2976_v59, %v516_v32 }
 0x116   :  { %v2564_v20 = vpop.eup %2563 }
 0x117   :  { %v569_v50 = vpack.c.bf16 %v553_v18, %v552_v57  ;;  %v457_v12 = vmul.f32 %v2576_v56, %v2564_v20 }
 0x118   :  { %v2566_v13 = vpop.eup %2565 }
 0x119   :  { %1045 = vmatmul.mubr.bf16.gmra.mrb[52].mxu0 %v569_v50  ;;  %1228 = vmatmul.mubr.bf16.gmra.mrb[52].mxu1 %v569_v50  ;;  %v458_v16 = vmul.f32 %v2576_v56, %v2566_v13  ;;  %v517_v59 = vmul.f32 %v487_v25, %v457_v12 }
 0x11a   :  { %1054 = vmatprep.mubr.bf16.mxu0 %v2611_v58  ;;  %1237 = vmatprep.mubr.bf16.mxu1 %v2611_v58  ;;  %v716_v58 = vsub.s32 3, %v703_v53 }
 0x11b   :  { %v518_v17 = vmul.f32 %v488_v15, %v458_v16  ;;  %v554_v21 = vadd.f32 %v2580_v19, %v517_v59 }
 0x11c   :  { %v3337_v35 = vrot.slane %v700_v28, %v716_v58 }
 0x11d   :  { %v555_v2 = vadd.f32 %v2580_v19, %v518_v17 }
 0x11f   :  { %v570_v24 = vpack.c.bf16 %v555_v2, %v554_v21 }
 0x121   :  { %1055 = vmatmul.mubr.bf16.gmra.mrb[56].mxu0 %v570_v24  ;;  %1238 = vmatmul.mubr.bf16.gmra.mrb[56].mxu1 %v570_v24 }
 0x184   :  { %v916_v33 = vpop.f32.mrb[0].mxu0  ;;  %v1099_v38 = vpop.f32.mrb[0].mxu1 }
 0x185   :  { %v917_v62 = vadd.f32 %v916_v33, %v3331_v61  ;;  %v1100_v0 = vadd.f32 %v1099_v38, %v3333_v46  ;;  %v918_v9 = vpop.f32.mrb[1].mxu0  ;;  %v1101_v47 = vpop.f32.mrb[1].mxu1 }
 0x186   :  { %v919_v34 = vadd.f32 %v918_v9, %v3335_v40  ;;  %v1102_v30 = vadd.f32 %v1101_v47, %v3337_v35  ;;  %v920_v39 = vpop.f32.mrb[2].mxu0  ;;  %v1103_v4 = vpop.f32.mrb[2].mxu1 }
 0x187   :  { %v921_v63 = vadd.f32 %v920_v39, %v3331_v61  ;;  %v1104_v41 = vadd.f32 %v1103_v4, %v3333_v46  ;;  %v922_v42 = vpop.f32.mrb[3].mxu0  ;;  %v1105_v43 = vpop.f32.mrb[3].mxu1  ;;  %v1248_v37 = vmax.f32 %v917_v62, 0.0  ;;  %v1250_v49 = vmax.f32 %v1100_v0, 0.0 }
 0x188   :  { %v923_v45 = vadd.f32 %v922_v42, %v3335_v40  ;;  %v1106_v5 = vadd.f32 %v1105_v43, %v3337_v35  ;;  %v1249_v8 = vmax.f32 %v919_v34, 0.0  ;;  %v1251_v54 = vmax.f32 %v1102_v30, 0.0 }
 0x189   :  { %v1252_v52 = vmax.f32 %v921_v63, 0.0  ;;  %v1254_v23 = vmax.f32 %v1104_v41, 0.0 }
 0x18a   :  { %v1253_v55 = vmax.f32 %v923_v45, 0.0  ;;  %v1255_v60 = vmax.f32 %v1106_v5, 0.0 }
 0x18b   :  { %v1398_v3 = vpack.c.bf16 %v1252_v52, %v1248_v37  ;;  %v1400_v29 = vpack.c.bf16 %v1254_v23, %v1250_v49 }
 0x18c   :  { %v1399_v22 = vpack.c.bf16 %v1253_v55, %v1249_v8  ;;  %v1401_v7 = vpack.c.bf16 %v1255_v60, %v1251_v54  ;;  %v926_v56 = vpop.f32.mrb[4].mxu0  ;;  %v1109_v31 = vpop.f32.mrb[4].mxu1 }
 0x18d   :  { %v927_v6 = vadd.f32 %v926_v56, %v3331_v61  ;;  %v1110_v36 = vadd.f32 %v1109_v31, %v3333_v46  ;;  %v928_v1 = vpop.f32.mrb[5].mxu0  ;;  %v1111_v11 = vpop.f32.mrb[5].mxu1 }
 0x18e   :  { %v929_v10 = vadd.f32 %v928_v1, %v3335_v40  ;;  %v1112_v32 = vadd.f32 %v1111_v11, %v3337_v35  ;;  %v930_v57 = vpop.f32.mrb[6].mxu0  ;;  %v1113_v18 = vpop.f32.mrb[6].mxu1  ;;  %1746 = vmatprep.mubr.bf16.mxu0 %v1399_v22  ;;  %1899 = vmatprep.mubr.bf16.mxu1 %v1401_v7 }
 0x18f   :  { %v931_v20 = vadd.f32 %v930_v57, %v3331_v61  ;;  %v1114_v51 = vadd.f32 %v1113_v18, %v3333_v46  ;;  %v932_v25 = vpop.f32.mrb[7].mxu0  ;;  %v1115_v50 = vpop.f32.mrb[7].mxu1  ;;  %1747 = vmatmul.mubr.bf16.vlgmr.msra.gmra.mrb[60].mxu0 %v1398_v3  ;;  %1900 = vmatmul.mubr.bf16.vlgmr.msra.gmra.mrb[60].mxu1 %v1400_v29  ;;  %v1256_v14 = vmax.f32 %v927_v6, 0.0  ;;  %v1258_v15 = vmax.f32 %v1110_v36, 0.0 }
 0x190   :  { %v933_v12 = vadd.f32 %v932_v25, %v3335_v40  ;;  %v1116_v13 = vadd.f32 %v1115_v50, %v3337_v35  ;;  %v1257_v17 = vmax.f32 %v929_v10, 0.0  ;;  %v1259_v19 = vmax.f32 %v1112_v32, 0.0 }
 0x191   :  { %v1260_v16 = vmax.f32 %v931_v20, 0.0  ;;  %v1262_v59 = vmax.f32 %v1114_v51, 0.0 }
 0x192   :  { %v1261_v21 = vmax.f32 %v933_v12, 0.0  ;;  %v1263_v2 = vmax.f32 %v1116_v13, 0.0 }
 0x193   :  { %v1402_v24 = vpack.c.bf16 %v1260_v16, %v1256_v14  ;;  %v1404_v48 = vpack.c.bf16 %v1262_v59, %v1258_v15 }
 0x194   :  { %v1403_v53 = vpack.c.bf16 %v1261_v21, %v1257_v17  ;;  %v1405_v26 = vpack.c.bf16 %v1263_v2, %v1259_v19  ;;  %v936_v27 = vpop.f32.mrb[8].mxu0  ;;  %v1119_v28 = vpop.f32.mrb[8].mxu1 }
 0x195   :  { %v937_v44 = vadd.f32 %v936_v27, %v3331_v61  ;;  %v1120_v58 = vadd.f32 %v1119_v28, %v3333_v46  ;;  %v938_v33 = vpop.f32.mrb[9].mxu0  ;;  %v1121_v38 = vpop.f32.mrb[9].mxu1 }
 0x196   :  { %v939_v62 = vadd.f32 %v938_v33, %v3335_v40  ;;  %v1122_v0 = vadd.f32 %v1121_v38, %v3337_v35  ;;  %v940_v9 = vpop.f32.mrb[10].mxu0  ;;  %v1123_v47 = vpop.f32.mrb[10].mxu1  ;;  %1754 = vmatprep.mubr.bf16.mxu0 %v1403_v53  ;;  %1907 = vmatprep.mubr.bf16.mxu1 %v1405_v26 }
 0x197   :  { %v941_v34 = vadd.f32 %v940_v9, %v3331_v61  ;;  %v1124_v30 = vadd.f32 %v1123_v47, %v3333_v46  ;;  %v942_v39 = vpop.f32.mrb[11].mxu0  ;;  %v1125_v4 = vpop.f32.mrb[11].mxu1  ;;  %1755 = vmatmul.mubr.bf16.gmra.mrb[64].mxu0 %v1402_v24  ;;  %1908 = vmatmul.mubr.bf16.gmra.mrb[64].mxu1 %v1404_v48  ;;  %v1264_v42 = vmax.f32 %v937_v44, 0.0  ;;  %v1266_v43 = vmax.f32 %v1120_v58, 0.0 }
 0x198   :  { %v943_v63 = vadd.f32 %v942_v39, %v3335_v40  ;;  %v1126_v41 = vadd.f32 %v1125_v4, %v3337_v35  ;;  %v1265_v37 = vmax.f32 %v939_v62, 0.0  ;;  %v1267_v49 = vmax.f32 %v1122_v0, 0.0 }
 0x199   :  { %v1268_v45 = vmax.f32 %v941_v34, 0.0  ;;  %v1270_v5 = vmax.f32 %v1124_v30, 0.0 }
 0x19a   :  { %v1269_v52 = vmax.f32 %v943_v63, 0.0  ;;  %v1271_v23 = vmax.f32 %v1126_v41, 0.0 }
 0x19b   :  { %v1406_v8 = vpack.c.bf16 %v1268_v45, %v1264_v42  ;;  %v1408_v54 = vpack.c.bf16 %v1270_v5, %v1266_v43 }
 0x19c   :  { %v1407_v55 = vpack.c.bf16 %v1269_v52, %v1265_v37  ;;  %v1409_v60 = vpack.c.bf16 %v1271_v23, %v1267_v49  ;;  %v946_v3 = vpop.f32.mrb[12].mxu0  ;;  %v1129_v29 = vpop.f32.mrb[12].mxu1 }
 0x19d   :  { %v947_v22 = vadd.f32 %v946_v3, %v3331_v61  ;;  %v1130_v7 = vadd.f32 %v1129_v29, %v3333_v46  ;;  %v948_v56 = vpop.f32.mrb[13].mxu0  ;;  %v1131_v31 = vpop.f32.mrb[13].mxu1 }
 0x19e   :  { %v949_v6 = vadd.f32 %v948_v56, %v3335_v40  ;;  %v1132_v36 = vadd.f32 %v1131_v31, %v3337_v35  ;;  %v950_v1 = vpop.f32.mrb[14].mxu0  ;;  %v1133_v11 = vpop.f32.mrb[14].mxu1  ;;  %1762 = vmatprep.mubr.bf16.mxu0 %v1407_v55  ;;  %1915 = vmatprep.mubr.bf16.mxu1 %v1409_v60 }
 0x19f   :  { %v951_v10 = vadd.f32 %v950_v1, %v3331_v61  ;;  %v1134_v32 = vadd.f32 %v1133_v11, %v3333_v46  ;;  %v952_v57 = vpop.f32.mrb[15].mxu0  ;;  %v1135_v18 = vpop.f32.mrb[15].mxu1  ;;  %1763 = vmatmul.mubr.bf16.gmra.mrb[68].mxu0 %v1406_v8  ;;  %1916 = vmatmul.mubr.bf16.gmra.mrb[68].mxu1 %v1408_v54  ;;  %v1272_v25 = vmax.f32 %v947_v22, 0.0  ;;  %v1274_v50 = vmax.f32 %v1130_v7, 0.0 }
 0x1a0   :  { %v953_v20 = vadd.f32 %v952_v57, %v3335_v40  ;;  %v1136_v51 = vadd.f32 %v1135_v18, %v3337_v35  ;;  %v1273_v14 = vmax.f32 %v949_v6, 0.0  ;;  %v1275_v15 = vmax.f32 %v1132_v36, 0.0 }
 0x1a1   :  { %v1276_v12 = vmax.f32 %v951_v10, 0.0  ;;  %v1278_v13 = vmax.f32 %v1134_v32, 0.0 }
 0x1a2   :  { %v1277_v16 = vmax.f32 %v953_v20, 0.0  ;;  %v1279_v59 = vmax.f32 %v1136_v51, 0.0 }
 0x1a3   :  { %v1410_v17 = vpack.c.bf16 %v1276_v12, %v1272_v25  ;;  %v1412_v19 = vpack.c.bf16 %v1278_v13, %v1274_v50 }
 0x1a4   :  { %v1411_v21 = vpack.c.bf16 %v1277_v16, %v1273_v14  ;;  %v1413_v2 = vpack.c.bf16 %v1279_v59, %v1275_v15  ;;  %v956_v24 = vpop.f32.mrb[16].mxu0  ;;  %v1139_v48 = vpop.f32.mrb[16].mxu1 }
 0x1a5   :  { %v957_v53 = vadd.f32 %v956_v24, %v3331_v61  ;;  %v1140_v26 = vadd.f32 %v1139_v48, %v3333_v46  ;;  %v958_v27 = vpop.f32.mrb[17].mxu0  ;;  %v1141_v28 = vpop.f32.mrb[17].mxu1 }
 0x1a6   :  { %v959_v44 = vadd.f32 %v958_v27, %v3335_v40  ;;  %v1142_v58 = vadd.f32 %v1141_v28, %v3337_v35  ;;  %v960_v33 = vpop.f32.mrb[18].mxu0  ;;  %v1143_v38 = vpop.f32.mrb[18].mxu1  ;;  %1770 = vmatprep.mubr.bf16.mxu0 %v1411_v21  ;;  %1923 = vmatprep.mubr.bf16.mxu1 %v1413_v2 }
 0x1a7   :  { %v961_v62 = vadd.f32 %v960_v33, %v3331_v61  ;;  %v1144_v0 = vadd.f32 %v1143_v38, %v3333_v46  ;;  %v962_v9 = vpop.f32.mrb[19].mxu0  ;;  %v1145_v47 = vpop.f32.mrb[19].mxu1  ;;  %1771 = vmatmul.mubr.bf16.gmra.mrb[72].mxu0 %v1410_v17  ;;  %1924 = vmatmul.mubr.bf16.gmra.mrb[72].mxu1 %v1412_v19  ;;  %v1280_v39 = vmax.f32 %v957_v53, 0.0  ;;  %v1282_v4 = vmax.f32 %v1140_v26, 0.0 }
 0x1a8   :  { %v963_v34 = vadd.f32 %v962_v9, %v3335_v40  ;;  %v1146_v30 = vadd.f32 %v1145_v47, %v3337_v35  ;;  %v1281_v42 = vmax.f32 %v959_v44, 0.0  ;;  %v1283_v43 = vmax.f32 %v1142_v58, 0.0 }
 0x1a9   :  { %v1284_v63 = vmax.f32 %v961_v62, 0.0  ;;  %v1286_v41 = vmax.f32 %v1144_v0, 0.0 }
 0x1aa   :  { %v1285_v45 = vmax.f32 %v963_v34, 0.0  ;;  %v1287_v5 = vmax.f32 %v1146_v30, 0.0 }
 0x1ab   :  { %v1414_v37 = vpack.c.bf16 %v1284_v63, %v1280_v39  ;;  %v1416_v49 = vpack.c.bf16 %v1286_v41, %v1282_v4 }
 0x1ac   :  { %v1415_v52 = vpack.c.bf16 %v1285_v45, %v1281_v42  ;;  %v1417_v23 = vpack.c.bf16 %v1287_v5, %v1283_v43  ;;  %v966_v8 = vpop.f32.mrb[20].mxu0  ;;  %v1149_v54 = vpop.f32.mrb[20].mxu1 }
 0x1ad   :  { %v967_v55 = vadd.f32 %v966_v8, %v3331_v61  ;;  %v1150_v60 = vadd.f32 %v1149_v54, %v3333_v46  ;;  %v968_v3 = vpop.f32.mrb[21].mxu0  ;;  %v1151_v29 = vpop.f32.mrb[21].mxu1 }
 0x1ae   :  { %v969_v22 = vadd.f32 %v968_v3, %v3335_v40  ;;  %v1152_v7 = vadd.f32 %v1151_v29, %v3337_v35  ;;  %v970_v56 = vpop.f32.mrb[22].mxu0  ;;  %v1153_v31 = vpop.f32.mrb[22].mxu1  ;;  %1778 = vmatprep.mubr.bf16.mxu0 %v1415_v52  ;;  %1931 = vmatprep.mubr.bf16.mxu1 %v1417_v23 }
 0x1af   :  { %v971_v6 = vadd.f32 %v970_v56, %v3331_v61  ;;  %v1154_v36 = vadd.f32 %v1153_v31, %v3333_v46  ;;  %v972_v1 = vpop.f32.mrb[23].mxu0  ;;  %v1155_v11 = vpop.f32.mrb[23].mxu1  ;;  %1779 = vmatmul.mubr.bf16.gmra.mrb[76].mxu0 %v1414_v37  ;;  %1932 = vmatmul.mubr.bf16.gmra.mrb[76].mxu1 %v1416_v49  ;;  %v1288_v57 = vmax.f32 %v967_v55, 0.0  ;;  %v1290_v18 = vmax.f32 %v1150_v60, 0.0 }
 0x1b0   :  { %v973_v10 = vadd.f32 %v972_v1, %v3335_v40  ;;  %v1156_v32 = vadd.f32 %v1155_v11, %v3337_v35  ;;  %v1289_v25 = vmax.f32 %v969_v22, 0.0  ;;  %v1291_v50 = vmax.f32 %v1152_v7, 0.0 }
 0x1b1   :  { %v1292_v20 = vmax.f32 %v971_v6, 0.0  ;;  %v1294_v51 = vmax.f32 %v1154_v36, 0.0 }
 0x1b2   :  { %v1293_v12 = vmax.f32 %v973_v10, 0.0  ;;  %v1295_v13 = vmax.f32 %v1156_v32, 0.0 }
 0x1b3   :  { %v1418_v14 = vpack.c.bf16 %v1292_v20, %v1288_v57  ;;  %v1420_v15 = vpack.c.bf16 %v1294_v51, %v1290_v18 }
 0x1b4   :  { %v1419_v16 = vpack.c.bf16 %v1293_v12, %v1289_v25  ;;  %v1421_v59 = vpack.c.bf16 %v1295_v13, %v1291_v50  ;;  %v976_v17 = vpop.f32.mrb[24].mxu0  ;;  %v1159_v19 = vpop.f32.mrb[24].mxu1 }
 0x1b5   :  { %v977_v21 = vadd.f32 %v976_v17, %v3331_v61  ;;  %v1160_v2 = vadd.f32 %v1159_v19, %v3333_v46  ;;  %v978_v24 = vpop.f32.mrb[25].mxu0  ;;  %v1161_v48 = vpop.f32.mrb[25].mxu1 }
 0x1b6   :  { %v979_v53 = vadd.f32 %v978_v24, %v3335_v40  ;;  %v1162_v26 = vadd.f32 %v1161_v48, %v3337_v35  ;;  %v980_v27 = vpop.f32.mrb[26].mxu0  ;;  %v1163_v28 = vpop.f32.mrb[26].mxu1  ;;  %1786 = vmatprep.mubr.bf16.mxu0 %v1419_v16  ;;  %1939 = vmatprep.mubr.bf16.mxu1 %v1421_v59 }
 0x1b7   :  { %v981_v44 = vadd.f32 %v980_v27, %v3331_v61  ;;  %v1164_v58 = vadd.f32 %v1163_v28, %v3333_v46  ;;  %v982_v33 = vpop.f32.mrb[27].mxu0  ;;  %v1165_v38 = vpop.f32.mrb[27].mxu1  ;;  %1787 = vmatmul.mubr.bf16.gmra.mrb[80].mxu0 %v1418_v14  ;;  %1940 = vmatmul.mubr.bf16.gmra.mrb[80].mxu1 %v1420_v15  ;;  %v1296_v9 = vmax.f32 %v977_v21, 0.0  ;;  %v1298_v47 = vmax.f32 %v1160_v2, 0.0 }
 0x1b8   :  { %v983_v62 = vadd.f32 %v982_v33, %v3335_v40  ;;  %v1166_v0 = vadd.f32 %v1165_v38, %v3337_v35  ;;  %v1297_v39 = vmax.f32 %v979_v53, 0.0  ;;  %v1299_v4 = vmax.f32 %v1162_v26, 0.0 }
 0x1b9   :  { %v1300_v34 = vmax.f32 %v981_v44, 0.0  ;;  %v1302_v30 = vmax.f32 %v1164_v58, 0.0 }
 0x1ba   :  { %v1301_v63 = vmax.f32 %v983_v62, 0.0  ;;  %v1303_v41 = vmax.f32 %v1166_v0, 0.0 }
 0x1bb   :  { %v1422_v42 = vpack.c.bf16 %v1300_v34, %v1296_v9  ;;  %v1424_v43 = vpack.c.bf16 %v1302_v30, %v1298_v47 }
 0x1bc   :  { %v1423_v45 = vpack.c.bf16 %v1301_v63, %v1297_v39  ;;  %v1425_v5 = vpack.c.bf16 %v1303_v41, %v1299_v4  ;;  %v986_v37 = vpop.f32.mrb[28].mxu0  ;;  %v1169_v49 = vpop.f32.mrb[28].mxu1 }
 0x1bd   :  { %v987_v52 = vadd.f32 %v986_v37, %v3331_v61  ;;  %v1170_v23 = vadd.f32 %v1169_v49, %v3333_v46  ;;  %v988_v8 = vpop.f32.mrb[29].mxu0  ;;  %v1171_v54 = vpop.f32.mrb[29].mxu1 }
 0x1be   :  { %v989_v55 = vadd.f32 %v988_v8, %v3335_v40  ;;  %v1172_v60 = vadd.f32 %v1171_v54, %v3337_v35  ;;  %v990_v3 = vpop.f32.mrb[30].mxu0  ;;  %v1173_v29 = vpop.f32.mrb[30].mxu1  ;;  %1794 = vmatprep.mubr.bf16.mxu0 %v1423_v45  ;;  %1947 = vmatprep.mubr.bf16.mxu1 %v1425_v5 }
 0x1bf   :  { %v991_v22 = vadd.f32 %v990_v3, %v3331_v61  ;;  %v1174_v7 = vadd.f32 %v1173_v29, %v3333_v46  ;;  %v992_v56 = vpop.f32.mrb[31].mxu0  ;;  %v1175_v31 = vpop.f32.mrb[31].mxu1  ;;  %1795 = vmatmul.mubr.bf16.gmra.mrb[84].mxu0 %v1422_v42  ;;  %1948 = vmatmul.mubr.bf16.gmra.mrb[84].mxu1 %v1424_v43  ;;  %v1304_v1 = vmax.f32 %v987_v52, 0.0  ;;  %v1306_v11 = vmax.f32 %v1170_v23, 0.0 }
 0x1c0   :  { %v993_v6 = vadd.f32 %v992_v56, %v3335_v40  ;;  %v1176_v36 = vadd.f32 %v1175_v31, %v3337_v35  ;;  %v1305_v57 = vmax.f32 %v989_v55, 0.0  ;;  %v1307_v18 = vmax.f32 %v1172_v60, 0.0 }
 0x1c1   :  { %v1308_v10 = vmax.f32 %v991_v22, 0.0  ;;  %v1310_v32 = vmax.f32 %v1174_v7, 0.0 }
 0x1c2   :  { %v1309_v20 = vmax.f32 %v993_v6, 0.0  ;;  %v1311_v51 = vmax.f32 %v1176_v36, 0.0 }
 0x1c3   :  { %v1426_v25 = vpack.c.bf16 %v1308_v10, %v1304_v1  ;;  %v1428_v50 = vpack.c.bf16 %v1310_v32, %v1306_v11 }
 0x1c4   :  { %v1427_v12 = vpack.c.bf16 %v1309_v20, %v1305_v57  ;;  %v1429_v13 = vpack.c.bf16 %v1311_v51, %v1307_v18  ;;  %v996_v14 = vpop.f32.mrb[32].mxu0  ;;  %v1179_v15 = vpop.f32.mrb[32].mxu1 }
 0x1c5   :  { %v997_v16 = vadd.f32 %v996_v14, %v3331_v61  ;;  %v1180_v59 = vadd.f32 %v1179_v15, %v3333_v46  ;;  %v998_v17 = vpop.f32.mrb[33].mxu0  ;;  %v1181_v19 = vpop.f32.mrb[33].mxu1 }
 0x1c6   :  { %v999_v21 = vadd.f32 %v998_v17, %v3335_v40  ;;  %v1182_v2 = vadd.f32 %v1181_v19, %v3337_v35  ;;  %v1000_v24 = vpop.f32.mrb[34].mxu0  ;;  %v1183_v48 = vpop.f32.mrb[34].mxu1  ;;  %1802 = vmatprep.mubr.bf16.mxu0 %v1427_v12  ;;  %1955 = vmatprep.mubr.bf16.mxu1 %v1429_v13 }
 0x1c7   :  { %v1001_v53 = vadd.f32 %v1000_v24, %v3331_v61  ;;  %v1184_v26 = vadd.f32 %v1183_v48, %v3333_v46  ;;  %v1002_v27 = vpop.f32.mrb[35].mxu0  ;;  %v1185_v28 = vpop.f32.mrb[35].mxu1  ;;  %1803 = vmatmul.mubr.bf16.gmra.mrb[88].mxu0 %v1426_v25  ;;  %1956 = vmatmul.mubr.bf16.gmra.mrb[88].mxu1 %v1428_v50  ;;  %v1312_v33 = vmax.f32 %v997_v16, 0.0  ;;  %v1314_v38 = vmax.f32 %v1180_v59, 0.0 }
 0x1c8   :  { %v1003_v44 = vadd.f32 %v1002_v27, %v3335_v40  ;;  %v1186_v58 = vadd.f32 %v1185_v28, %v3337_v35  ;;  %v1313_v9 = vmax.f32 %v999_v21, 0.0  ;;  %v1315_v47 = vmax.f32 %v1182_v2, 0.0 }
 0x1c9   :  { %v1316_v62 = vmax.f32 %v1001_v53, 0.0  ;;  %v1318_v0 = vmax.f32 %v1184_v26, 0.0 }
 0x1ca   :  { %v1317_v34 = vmax.f32 %v1003_v44, 0.0  ;;  %v1319_v30 = vmax.f32 %v1186_v58, 0.0 }
 0x1cb   :  { %v1430_v39 = vpack.c.bf16 %v1316_v62, %v1312_v33  ;;  %v1432_v4 = vpack.c.bf16 %v1318_v0, %v1314_v38 }
 0x1cc   :  { %v1431_v63 = vpack.c.bf16 %v1317_v34, %v1313_v9  ;;  %v1433_v41 = vpack.c.bf16 %v1319_v30, %v1315_v47  ;;  %v1006_v42 = vpop.f32.mrb[36].mxu0  ;;  %v1189_v43 = vpop.f32.mrb[36].mxu1 }
 0x1cd   :  { %v1007_v45 = vadd.f32 %v1006_v42, %v3331_v61  ;;  %v1190_v5 = vadd.f32 %v1189_v43, %v3333_v46  ;;  %v1008_v37 = vpop.f32.mrb[37].mxu0  ;;  %v1191_v49 = vpop.f32.mrb[37].mxu1 }
 0x1ce   :  { %v1009_v52 = vadd.f32 %v1008_v37, %v3335_v40  ;;  %v1192_v23 = vadd.f32 %v1191_v49, %v3337_v35  ;;  %v1010_v8 = vpop.f32.mrb[38].mxu0  ;;  %v1193_v54 = vpop.f32.mrb[38].mxu1  ;;  %1810 = vmatprep.mubr.bf16.mxu0 %v1431_v63  ;;  %1963 = vmatprep.mubr.bf16.mxu1 %v1433_v41 }
 0x1cf   :  { %v1011_v55 = vadd.f32 %v1010_v8, %v3331_v61  ;;  %v1194_v60 = vadd.f32 %v1193_v54, %v3333_v46  ;;  %v1012_v3 = vpop.f32.mrb[39].mxu0  ;;  %v1195_v29 = vpop.f32.mrb[39].mxu1  ;;  %1811 = vmatmul.mubr.bf16.gmra.mrb[92].mxu0 %v1430_v39  ;;  %1964 = vmatmul.mubr.bf16.gmra.mrb[92].mxu1 %v1432_v4  ;;  %v1320_v56 = vmax.f32 %v1007_v45, 0.0  ;;  %v1322_v31 = vmax.f32 %v1190_v5, 0.0 }
 0x1d0   :  { %v1013_v22 = vadd.f32 %v1012_v3, %v3335_v40  ;;  %v1196_v7 = vadd.f32 %v1195_v29, %v3337_v35  ;;  %v1321_v1 = vmax.f32 %v1009_v52, 0.0  ;;  %v1323_v11 = vmax.f32 %v1192_v23, 0.0 }
 0x1d1   :  { %v1324_v6 = vmax.f32 %v1011_v55, 0.0  ;;  %v1326_v36 = vmax.f32 %v1194_v60, 0.0 }
 0x1d2   :  { %v1325_v10 = vmax.f32 %v1013_v22, 0.0  ;;  %v1327_v32 = vmax.f32 %v1196_v7, 0.0 }
 0x1d3   :  { %v1434_v57 = vpack.c.bf16 %v1324_v6, %v1320_v56  ;;  %v1436_v18 = vpack.c.bf16 %v1326_v36, %v1322_v31 }
 0x1d4   :  { %v1435_v20 = vpack.c.bf16 %v1325_v10, %v1321_v1  ;;  %v1437_v51 = vpack.c.bf16 %v1327_v32, %v1323_v11  ;;  %v1016_v25 = vpop.f32.mrb[40].mxu0  ;;  %v1199_v50 = vpop.f32.mrb[40].mxu1 }
 0x1d5   :  { %v1017_v12 = vadd.f32 %v1016_v25, %v3331_v61  ;;  %v1200_v13 = vadd.f32 %v1199_v50, %v3333_v46  ;;  %v1018_v14 = vpop.f32.mrb[41].mxu0  ;;  %v1201_v15 = vpop.f32.mrb[41].mxu1 }
 0x1d6   :  { %v1019_v16 = vadd.f32 %v1018_v14, %v3335_v40  ;;  %v1202_v59 = vadd.f32 %v1201_v15, %v3337_v35  ;;  %v1020_v17 = vpop.f32.mrb[42].mxu0  ;;  %v1203_v19 = vpop.f32.mrb[42].mxu1  ;;  %1818 = vmatprep.mubr.bf16.mxu0 %v1435_v20  ;;  %1971 = vmatprep.mubr.bf16.mxu1 %v1437_v51 }
 0x1d7   :  { %v1021_v21 = vadd.f32 %v1020_v17, %v3331_v61  ;;  %v1204_v2 = vadd.f32 %v1203_v19, %v3333_v46  ;;  %v1022_v24 = vpop.f32.mrb[43].mxu0  ;;  %v1205_v48 = vpop.f32.mrb[43].mxu1  ;;  %1819 = vmatmul.mubr.bf16.gmra.mrb[96].mxu0 %v1434_v57  ;;  %1972 = vmatmul.mubr.bf16.gmra.mrb[96].mxu1 %v1436_v18  ;;  %v1328_v27 = vmax.f32 %v1017_v12, 0.0  ;;  %v1330_v28 = vmax.f32 %v1200_v13, 0.0 }
 0x1d8   :  { %v1023_v53 = vadd.f32 %v1022_v24, %v3335_v40  ;;  %v1206_v26 = vadd.f32 %v1205_v48, %v3337_v35  ;;  %v1329_v33 = vmax.f32 %v1019_v16, 0.0  ;;  %v1331_v38 = vmax.f32 %v1202_v59, 0.0 }
 0x1d9   :  { %v1332_v44 = vmax.f32 %v1021_v21, 0.0  ;;  %v1334_v58 = vmax.f32 %v1204_v2, 0.0 }
 0x1da   :  { %v1333_v62 = vmax.f32 %v1023_v53, 0.0  ;;  %v1335_v0 = vmax.f32 %v1206_v26, 0.0 }
 0x1db   :  { %v1438_v9 = vpack.c.bf16 %v1332_v44, %v1328_v27  ;;  %v1440_v47 = vpack.c.bf16 %v1334_v58, %v1330_v28 }
 0x1dc   :  { %v1439_v34 = vpack.c.bf16 %v1333_v62, %v1329_v33  ;;  %v1441_v30 = vpack.c.bf16 %v1335_v0, %v1331_v38  ;;  %v1026_v39 = vpop.f32.mrb[44].mxu0  ;;  %v1209_v4 = vpop.f32.mrb[44].mxu1 }
 0x1dd   :  { %v1027_v63 = vadd.f32 %v1026_v39, %v3331_v61  ;;  %v1210_v41 = vadd.f32 %v1209_v4, %v3333_v46  ;;  %v1028_v42 = vpop.f32.mrb[45].mxu0  ;;  %v1211_v43 = vpop.f32.mrb[45].mxu1 }
 0x1de   :  { %v1029_v45 = vadd.f32 %v1028_v42, %v3335_v40  ;;  %v1212_v5 = vadd.f32 %v1211_v43, %v3337_v35  ;;  %v1030_v37 = vpop.f32.mrb[46].mxu0  ;;  %v1213_v49 = vpop.f32.mrb[46].mxu1  ;;  %1826 = vmatprep.mubr.bf16.mxu0 %v1439_v34  ;;  %1979 = vmatprep.mubr.bf16.mxu1 %v1441_v30 }
 0x1df   :  { %v1031_v52 = vadd.f32 %v1030_v37, %v3331_v61  ;;  %v1214_v23 = vadd.f32 %v1213_v49, %v3333_v46  ;;  %v1032_v8 = vpop.f32.mrb[47].mxu0  ;;  %v1215_v54 = vpop.f32.mrb[47].mxu1  ;;  %1827 = vmatmul.mubr.bf16.gmra.mrb[100].mxu0 %v1438_v9  ;;  %1980 = vmatmul.mubr.bf16.gmra.mrb[100].mxu1 %v1440_v47  ;;  %v1336_v3 = vmax.f32 %v1027_v63, 0.0  ;;  %v1338_v29 = vmax.f32 %v1210_v41, 0.0 }
 0x1e0   :  { %v1033_v55 = vadd.f32 %v1032_v8, %v3335_v40  ;;  %v1216_v60 = vadd.f32 %v1215_v54, %v3337_v35  ;;  %v1337_v56 = vmax.f32 %v1029_v45, 0.0  ;;  %v1339_v31 = vmax.f32 %v1212_v5, 0.0 }
 0x1e1   :  { %v1340_v22 = vmax.f32 %v1031_v52, 0.0  ;;  %v1342_v7 = vmax.f32 %v1214_v23, 0.0 }
 0x1e2   :  { %v1341_v6 = vmax.f32 %v1033_v55, 0.0  ;;  %v1343_v36 = vmax.f32 %v1216_v60, 0.0 }
 0x1e3   :  { %v1442_v1 = vpack.c.bf16 %v1340_v22, %v1336_v3  ;;  %v1444_v11 = vpack.c.bf16 %v1342_v7, %v1338_v29 }
 0x1e4   :  { %v1443_v10 = vpack.c.bf16 %v1341_v6, %v1337_v56  ;;  %v1445_v32 = vpack.c.bf16 %v1343_v36, %v1339_v31  ;;  %v1036_v57 = vpop.f32.mrb[48].mxu0  ;;  %v1219_v18 = vpop.f32.mrb[48].mxu1 }
 0x1e5   :  { %v1037_v20 = vadd.f32 %v1036_v57, %v3331_v61  ;;  %v1220_v51 = vadd.f32 %v1219_v18, %v3333_v46  ;;  %v1038_v25 = vpop.f32.mrb[49].mxu0  ;;  %v1221_v50 = vpop.f32.mrb[49].mxu1 }
 0x1e6   :  { %v1039_v12 = vadd.f32 %v1038_v25, %v3335_v40  ;;  %v1222_v13 = vadd.f32 %v1221_v50, %v3337_v35  ;;  %v1040_v14 = vpop.f32.mrb[50].mxu0  ;;  %v1223_v15 = vpop.f32.mrb[50].mxu1  ;;  %1834 = vmatprep.mubr.bf16.mxu0 %v1443_v10  ;;  %1987 = vmatprep.mubr.bf16.mxu1 %v1445_v32 }
 0x1e7   :  { %v1041_v16 = vadd.f32 %v1040_v14, %v3331_v61  ;;  %v1224_v59 = vadd.f32 %v1223_v15, %v3333_v46  ;;  %v1042_v17 = vpop.f32.mrb[51].mxu0  ;;  %v1225_v19 = vpop.f32.mrb[51].mxu1  ;;  %1835 = vmatmul.mubr.bf16.gmra.mrb[104].mxu0 %v1442_v1  ;;  %1988 = vmatmul.mubr.bf16.gmra.mrb[104].mxu1 %v1444_v11  ;;  %v1344_v24 = vmax.f32 %v1037_v20, 0.0  ;;  %v1346_v48 = vmax.f32 %v1220_v51, 0.0 }
 0x1e8   :  { %v1043_v21 = vadd.f32 %v1042_v17, %v3335_v40  ;;  %v1226_v2 = vadd.f32 %v1225_v19, %v3337_v35  ;;  %v1345_v27 = vmax.f32 %v1039_v12, 0.0  ;;  %v1347_v28 = vmax.f32 %v1222_v13, 0.0 }
 0x1e9   :  { %v1348_v53 = vmax.f32 %v1041_v16, 0.0  ;;  %v1350_v26 = vmax.f32 %v1224_v59, 0.0 }
 0x1ea   :  { %v1349_v44 = vmax.f32 %v1043_v21, 0.0  ;;  %v1351_v58 = vmax.f32 %v1226_v2, 0.0 }
 0x1eb   :  { %v1446_v33 = vpack.c.bf16 %v1348_v53, %v1344_v24  ;;  %v1448_v38 = vpack.c.bf16 %v1350_v26, %v1346_v48 }
 0x1ec   :  { %v1447_v62 = vpack.c.bf16 %v1349_v44, %v1345_v27  ;;  %v1449_v0 = vpack.c.bf16 %v1351_v58, %v1347_v28  ;;  %v1046_v9 = vpop.f32.mrb[52].mxu0  ;;  %v1229_v47 = vpop.f32.mrb[52].mxu1 }
 0x1ed   :  { %v1047_v34 = vadd.f32 %v1046_v9, %v3331_v61  ;;  %v1230_v30 = vadd.f32 %v1229_v47, %v3333_v46  ;;  %v1048_v39 = vpop.f32.mrb[53].mxu0  ;;  %v1231_v4 = vpop.f32.mrb[53].mxu1 }
 0x1ee   :  { %v1049_v63 = vadd.f32 %v1048_v39, %v3335_v40  ;;  %v1232_v41 = vadd.f32 %v1231_v4, %v3337_v35  ;;  %v1050_v42 = vpop.f32.mrb[54].mxu0  ;;  %v1233_v43 = vpop.f32.mrb[54].mxu1  ;;  %1842 = vmatprep.mubr.bf16.mxu0 %v1447_v62  ;;  %1995 = vmatprep.mubr.bf16.mxu1 %v1449_v0  ;;  %v2581_v62 = vld [vmem:[%s3674_s0] sm:$0xff] }
 0x1ef   :  { %v1051_v45 = vadd.f32 %v1050_v42, %v3331_v61  ;;  %v1234_v5 = vadd.f32 %v1233_v43, %v3333_v46  ;;  %v1052_v37 = vpop.f32.mrb[55].mxu0  ;;  %v1235_v49 = vpop.f32.mrb[55].mxu1  ;;  %1843 = vmatmul.mubr.bf16.gmra.mrb[108].mxu0 %v1446_v33  ;;  %1996 = vmatmul.mubr.bf16.gmra.mrb[108].mxu1 %v1448_v38  ;;  %v1352_v8 = vmax.f32 %v1047_v34, 0.0  ;;  %v1354_v54 = vmax.f32 %v1230_v30, 0.0 }
 0x1f0   :  { %v1053_v52 = vadd.f32 %v1052_v37, %v3335_v40  ;;  %v1236_v23 = vadd.f32 %v1235_v49, %v3337_v35  ;;  %v1353_v3 = vmax.f32 %v1049_v63, 0.0  ;;  %v1355_v29 = vmax.f32 %v1232_v41, 0.0  ;;  %v2582_v41 = vld [vmem:[%s3674_s0 + $0x8] sm:$0xff] }
 0x1f1   :  { %v1356_v55 = vmax.f32 %v1051_v45, 0.0  ;;  %v1358_v60 = vmax.f32 %v1234_v5, 0.0 }
 0x1f2   :  { %v1357_v22 = vmax.f32 %v1053_v52, 0.0  ;;  %v1359_v7 = vmax.f32 %v1236_v23, 0.0 }
 0x1f3   :  { %v1450_v56 = vpack.c.bf16 %v1356_v55, %v1352_v8  ;;  %v1452_v31 = vpack.c.bf16 %v1358_v60, %v1354_v54 }
 0x1f4   :  { %v1451_v6 = vpack.c.bf16 %v1357_v22, %v1353_v3  ;;  %v1453_v36 = vpack.c.bf16 %v1359_v7, %v1355_v29  ;;  %v1056_v1 = vpop.f32.mrb[56].mxu0  ;;  %v1239_v11 = vpop.f32.mrb[56].mxu1 }
 0x1f5   :  { %v1057_v10 = vadd.f32 %v1056_v1, %v3331_v61  ;;  %v1240_v32 = vadd.f32 %v1239_v11, %v3333_v46  ;;  %v1058_v57 = vpop.f32.mrb[57].mxu0  ;;  %v1241_v18 = vpop.f32.mrb[57].mxu1 }
 0x1f6   :  { %v1059_v20 = vadd.f32 %v1058_v57, %v3335_v40  ;;  %v1242_v51 = vadd.f32 %v1241_v18, %v3337_v35  ;;  %v1060_v25 = vpop.f32.mrb[58].mxu0  ;;  %v1243_v50 = vpop.f32.mrb[58].mxu1  ;;  %1850 = vmatprep.mubr.bf16.mxu0 %v1451_v6  ;;  %2003 = vmatprep.mubr.bf16.mxu1 %v1453_v36 }
 0x1f7   :  { %v1061_v12 = vadd.f32 %v1060_v25, %v3331_v61  ;;  %v1244_v13 = vadd.f32 %v1243_v50, %v3333_v46  ;;  %v1062_v14 = vpop.f32.mrb[59].mxu0  ;;  %v1245_v15 = vpop.f32.mrb[59].mxu1  ;;  %1851 = vmatmul.mubr.bf16.gmra.mrb[112].mxu0 %v1450_v56  ;;  %2004 = vmatmul.mubr.bf16.gmra.mrb[112].mxu1 %v1452_v31  ;;  %v1360_v17 = vmax.f32 %v1057_v10, 0.0  ;;  %v1362_v19 = vmax.f32 %v1240_v32, 0.0 }
 0x1f8   :  { %v1063_v16 = vadd.f32 %v1062_v14, %v3335_v40  ;;  %v1246_v59 = vadd.f32 %v1245_v15, %v3337_v35  ;;  %v1361_v24 = vmax.f32 %v1059_v20, 0.0  ;;  %v1363_v48 = vmax.f32 %v1242_v51, 0.0  ;;  %v3462_v40 = vld [vmem:[%s3680_s6] ss:$0 sm:$0xff] }
 0x1f9   :  { %v1364_v21 = vmax.f32 %v1061_v12, 0.0  ;;  %v1366_v2 = vmax.f32 %v1244_v13, 0.0  ;;  %v593_v0 = vadd.f32 %v2581_v62, %v3462_v40  ;;  %v594_v42 = vadd.f32 %v2582_v41, %v3462_v40 }
 0x1fa   :  { %v1365_v53 = vmax.f32 %v1063_v16, 0.0  ;;  %v1367_v26 = vmax.f32 %v1246_v59, 0.0 }
 0x1fb   :  { %v1454_v27 = vpack.c.bf16 %v1364_v21, %v1360_v17  ;;  %v1456_v61 = vpack.c.bf16 %v1366_v2, %v1362_v19 }
 0x1fc   :  { %v1455_v28 = vpack.c.bf16 %v1365_v53, %v1361_v24  ;;  %v1457_v46 = vpack.c.bf16 %v1367_v26, %v1363_v48 }
 0x1fe   :  { %1858 = vmatprep.mubr.bf16.mxu0 %v1455_v28  ;;  %2011 = vmatprep.mubr.bf16.mxu1 %v1457_v46 }
 0x1ff   :  { %1859 = vmatmul.mubr.bf16.gmra.mrb[116].mxu0 %v1454_v27  ;;  %2012 = vmatmul.mubr.bf16.gmra.mrb[116].mxu1 %v1456_v61 }
 0x262   :  { %v2230_v35 = vpop.f32.mrb[60].mxu0  ;;  %v2336_v44 = vpop.f32.mrb[60].mxu1 }
 0x263   :  { %v2231_v58 = vpop.f32.mrb[61].mxu0  ;;  %v2337_v33 = vpop.f32.mrb[61].mxu1 }
 0x264   :  { %v2232_v38 = vadd.f32 %v2231_v58, %v2230_v35  ;;  %v2338_v9 = vadd.f32 %v2337_v33, %v2336_v44  ;;  %v2233_v47 = vpop.f32.mrb[62].mxu0  ;;  %v2339_v34 = vpop.f32.mrb[62].mxu1 }
 0x265   :  { %v2234_v30 = vpop.f32.mrb[63].mxu0  ;;  %v2340_v39 = vpop.f32.mrb[63].mxu1 }
 0x266   :  { %v1902_v4 = vadd.f32 %v2338_v9, %v2232_v38  ;;  %v2235_v63 = vadd.f32 %v2234_v30, %v2233_v47  ;;  %v2341_v43 = vadd.f32 %v2340_v39, %v2339_v34 }
 0x268   :  { %v2020_v45 = vadd.f32 %v1902_v4, %v593_v0  ;;  %v1905_v5 = vadd.f32 %v2341_v43, %v2235_v63 }
 0x26a   :  { %2113 = vst [vmem:[%s3681_s7] sm:$0xff] %v2020_v45  ;;  %v2021_v37 = vadd.f32 %v1905_v5, %v594_v42  ;;  %v2236_v49 = vpop.f32.mrb[64].mxu0  ;;  %v2342_v52 = vpop.f32.mrb[64].mxu1 }
 0x26b   :  { %v2237_v23 = vpop.f32.mrb[65].mxu0  ;;  %v2343_v8 = vpop.f32.mrb[65].mxu1 }
 0x26c   :  { %2114 = vst [vmem:[%s3681_s7 + $0x8] sm:$0xff] %v2021_v37  ;;  %v2238_v54 = vadd.f32 %v2237_v23, %v2236_v49  ;;  %v2344_v3 = vadd.f32 %v2343_v8, %v2342_v52  ;;  %v2239_v29 = vpop.f32.mrb[66].mxu0  ;;  %v2345_v22 = vpop.f32.mrb[66].mxu1 }
 0x26d   :  { %v2240_v7 = vpop.f32.mrb[67].mxu0  ;;  %v2346_v56 = vpop.f32.mrb[67].mxu1 }
 0x26e   :  { %v1910_v31 = vadd.f32 %v2344_v3, %v2238_v54  ;;  %v2241_v6 = vadd.f32 %v2240_v7, %v2239_v29  ;;  %v2347_v11 = vadd.f32 %v2346_v56, %v2345_v22 }
 0x270   :  { %v1913_v32 = vadd.f32 %v2347_v11, %v2241_v6 }
 0x272   :  { %v2242_v18 = vpop.f32.mrb[68].mxu0  ;;  %v2348_v20 = vpop.f32.mrb[68].mxu1 }
 0x273   :  { %v2583_v55 = vld [vmem:[%s3674_s0 + $0x10] sm:$0xff]  ;;  %v2584_v36 = vld [vmem:[%s3674_s0 + $0x18] sm:$0xff]  ;;  %v2243_v51 = vpop.f32.mrb[69].mxu0  ;;  %v2349_v25 = vpop.f32.mrb[69].mxu1 }
 0x274   :  { %v595_v60 = vadd.f32 %v2583_v55, %v3462_v40  ;;  %v596_v1 = vadd.f32 %v2584_v36, %v3462_v40  ;;  %v2244_v50 = vadd.f32 %v2243_v51, %v2242_v18  ;;  %v2350_v14 = vadd.f32 %v2349_v25, %v2348_v20  ;;  %v2245_v15 = vpop.f32.mrb[70].mxu0  ;;  %v2351_v16 = vpop.f32.mrb[70].mxu1 }
 0x275   :  { %v2246_v59 = vpop.f32.mrb[71].mxu0  ;;  %v2352_v17 = vpop.f32.mrb[71].mxu1 }
 0x276   :  { %v2022_v10 = vadd.f32 %v1910_v31, %v595_v60  ;;  %v2023_v57 = vadd.f32 %v1913_v32, %v596_v1  ;;  %v1918_v19 = vadd.f32 %v2350_v14, %v2244_v50  ;;  %v2247_v21 = vadd.f32 %v2246_v59, %v2245_v15 }
 0x277   :  { %v2353_v48 = vadd.f32 %v2352_v17, %v2351_v16 }
 0x278   :  { %2115 = vst [vmem:[%s3681_s7 + $0x10] sm:$0xff] %v2022_v10  ;;  %2116 = vst [vmem:[%s3681_s7 + $0x18] sm:$0xff] %v2023_v57 }
 0x279   :  { %v1921_v26 = vadd.f32 %v2353_v48, %v2247_v21 }
 0x27a   :  { %v2248_v61 = vpop.f32.mrb[72].mxu0  ;;  %v2354_v28 = vpop.f32.mrb[72].mxu1 }
 0x27b   :  { %v2249_v46 = vpop.f32.mrb[73].mxu0  ;;  %v2355_v35 = vpop.f32.mrb[73].mxu1 }
 0x27c   :  { %v2250_v44 = vadd.f32 %v2249_v46, %v2248_v61  ;;  %v2356_v38 = vadd.f32 %v2355_v35, %v2354_v28  ;;  %v2251_v62 = vpop.f32.mrb[74].mxu0  ;;  %v2357_v0 = vpop.f32.mrb[74].mxu1 }
 0x27d   :  { %v2252_v9 = vpop.f32.mrb[75].mxu0  ;;  %v2358_v47 = vpop.f32.mrb[75].mxu1 }
 0x27e   :  { %v1926_v34 = vadd.f32 %v2356_v38, %v2250_v44  ;;  %v2253_v30 = vadd.f32 %v2252_v9, %v2251_v62  ;;  %v2359_v63 = vadd.f32 %v2358_v47, %v2357_v0 }
 0x27f   :  { %v2585_v12 = vld [vmem:[%s3674_s0 + $0x20] sm:$0xff]  ;;  %v2586_v2 = vld [vmem:[%s3674_s0 + $0x28] sm:$0xff] }
 0x280   :  { %v597_v13 = vadd.f32 %v2585_v12, %v3462_v40  ;;  %v598_v24 = vadd.f32 %v2586_v2, %v3462_v40  ;;  %v1929_v42 = vadd.f32 %v2359_v63, %v2253_v30 }
 0x282   :  { %v2024_v53 = vadd.f32 %v1918_v19, %v597_v13  ;;  %v2025_v27 = vadd.f32 %v1921_v26, %v598_v24  ;;  %v2254_v45 = vpop.f32.mrb[76].mxu0  ;;  %v2360_v5 = vpop.f32.mrb[76].mxu1 }
 0x283   :  { %v2255_v37 = vpop.f32.mrb[77].mxu0  ;;  %v2361_v49 = vpop.f32.mrb[77].mxu1 }
 0x284   :  { %2117 = vst [vmem:[%s3681_s7 + $0x20] sm:$0xff] %v2024_v53  ;;  %2118 = vst [vmem:[%s3681_s7 + $0x28] sm:$0xff] %v2025_v27  ;;  %v2256_v52 = vadd.f32 %v2255_v37, %v2254_v45  ;;  %v2362_v54 = vadd.f32 %v2361_v49, %v2360_v5  ;;  %v2257_v55 = vpop.f32.mrb[78].mxu0  ;;  %v2363_v60 = vpop.f32.mrb[78].mxu1 }
 0x285   :  { %v2258_v3 = vpop.f32.mrb[79].mxu0  ;;  %v2364_v29 = vpop.f32.mrb[79].mxu1 }
 0x286   :  { %v1934_v22 = vadd.f32 %v2362_v54, %v2256_v52  ;;  %v2259_v7 = vadd.f32 %v2258_v3, %v2257_v55  ;;  %v2365_v6 = vadd.f32 %v2364_v29, %v2363_v60 }
 0x288   :  { %v1937_v1 = vadd.f32 %v2365_v6, %v2259_v7 }
 0x28a   :  { %v2260_v10 = vpop.f32.mrb[80].mxu0  ;;  %v2366_v32 = vpop.f32.mrb[80].mxu1 }
 0x28b   :  { %v2587_v58 = vld [vmem:[%s3674_s0 + $0x30] sm:$0xff]  ;;  %v2588_v39 = vld [vmem:[%s3674_s0 + $0x38] sm:$0xff]  ;;  %v2261_v57 = vpop.f32.mrb[81].mxu0  ;;  %v2367_v18 = vpop.f32.mrb[81].mxu1 }
 0x28c   :  { %v599_v33 = vadd.f32 %v2587_v58, %v3462_v40  ;;  %v600_v4 = vadd.f32 %v2588_v39, %v3462_v40  ;;  %v2262_v20 = vadd.f32 %v2261_v57, %v2260_v10  ;;  %v2368_v50 = vadd.f32 %v2367_v18, %v2366_v32  ;;  %v2263_v12 = vpop.f32.mrb[82].mxu0  ;;  %v2369_v13 = vpop.f32.mrb[82].mxu1 }
 0x28d   :  { %v2264_v14 = vpop.f32.mrb[83].mxu0  ;;  %v2370_v15 = vpop.f32.mrb[83].mxu1 }
 0x28e   :  { %v2026_v41 = vadd.f32 %v1926_v34, %v599_v33  ;;  %v2027_v43 = vadd.f32 %v1929_v42, %v600_v4  ;;  %v1942_v16 = vadd.f32 %v2368_v50, %v2262_v20  ;;  %v2265_v59 = vadd.f32 %v2264_v14, %v2263_v12 }
 0x28f   :  { %v2371_v21 = vadd.f32 %v2370_v15, %v2369_v13 }
 0x290   :  { %2119 = vst [vmem:[%s3681_s7 + $0x30] sm:$0xff] %v2026_v41  ;;  %2120 = vst [vmem:[%s3681_s7 + $0x38] sm:$0xff] %v2027_v43 }
 0x291   :  { %v1945_v24 = vadd.f32 %v2371_v21, %v2265_v59 }
 0x292   :  { %v2266_v53 = vpop.f32.mrb[84].mxu0  ;;  %v2372_v26 = vpop.f32.mrb[84].mxu1 }
 0x293   :  { %v2267_v27 = vpop.f32.mrb[85].mxu0  ;;  %v2373_v61 = vpop.f32.mrb[85].mxu1 }
 0x294   :  { %v2268_v28 = vadd.f32 %v2267_v27, %v2266_v53  ;;  %v2374_v44 = vadd.f32 %v2373_v61, %v2372_v26  ;;  %v2269_v58 = vpop.f32.mrb[86].mxu0  ;;  %v2375_v33 = vpop.f32.mrb[86].mxu1 }
 0x295   :  { %v2270_v38 = vpop.f32.mrb[87].mxu0  ;;  %v2376_v62 = vpop.f32.mrb[87].mxu1 }
 0x296   :  { %v1950_v0 = vadd.f32 %v2374_v44, %v2268_v28  ;;  %v2271_v9 = vadd.f32 %v2270_v38, %v2269_v58  ;;  %v2377_v30 = vadd.f32 %v2376_v62, %v2375_v33 }
 0x297   :  { %v2589_v23 = vld [vmem:[%s3674_s0 + $0x40] sm:$0xff]  ;;  %v2590_v56 = vld [vmem:[%s3674_s0 + $0x48] sm:$0xff] }
 0x298   :  { %v601_v8 = vadd.f32 %v2589_v23, %v3462_v40  ;;  %v602_v31 = vadd.f32 %v2590_v56, %v3462_v40  ;;  %v1953_v4 = vadd.f32 %v2377_v30, %v2271_v9 }
 0x29a   :  { %v2028_v36 = vadd.f32 %v1934_v22, %v601_v8  ;;  %v2029_v11 = vadd.f32 %v1937_v1, %v602_v31  ;;  %v2272_v41 = vpop.f32.mrb[88].mxu0  ;;  %v2378_v42 = vpop.f32.mrb[88].mxu1 }
 0x29b   :  { %v2273_v43 = vpop.f32.mrb[89].mxu0  ;;  %v2379_v45 = vpop.f32.mrb[89].mxu1 }
 0x29c   :  { %2121 = vst [vmem:[%s3681_s7 + $0x40] sm:$0xff] %v2028_v36  ;;  %2122 = vst [vmem:[%s3681_s7 + $0x48] sm:$0xff] %v2029_v11  ;;  %v2274_v5 = vadd.f32 %v2273_v43, %v2272_v41  ;;  %v2380_v52 = vadd.f32 %v2379_v45, %v2378_v42  ;;  %v2275_v23 = vpop.f32.mrb[90].mxu0  ;;  %v2381_v8 = vpop.f32.mrb[90].mxu1 }
 0x29d   :  { %v2276_v54 = vpop.f32.mrb[91].mxu0  ;;  %v2382_v55 = vpop.f32.mrb[91].mxu1 }
 0x29e   :  { %v1958_v60 = vadd.f32 %v2380_v52, %v2274_v5  ;;  %v2277_v3 = vadd.f32 %v2276_v54, %v2275_v23  ;;  %v2383_v7 = vadd.f32 %v2382_v55, %v2381_v8 }
 0x2a0   :  { %v1961_v31 = vadd.f32 %v2383_v7, %v2277_v3 }
 0x2a2   :  { %v2278_v36 = vpop.f32.mrb[92].mxu0  ;;  %v2384_v1 = vpop.f32.mrb[92].mxu1 }
 0x2a3   :  { %v2591_v51 = vld [vmem:[%s3674_s0 + $0x50] sm:$0xff]  ;;  %v2592_v17 = vld [vmem:[%s3674_s0 + $0x58] sm:$0xff]  ;;  %v2279_v11 = vpop.f32.mrb[93].mxu0  ;;  %v2385_v10 = vpop.f32.mrb[93].mxu1 }
 0x2a4   :  { %v603_v25 = vadd.f32 %v2591_v51, %v3462_v40  ;;  %v604_v19 = vadd.f32 %v2592_v17, %v3462_v40  ;;  %v2280_v32 = vadd.f32 %v2279_v11, %v2278_v36  ;;  %v2386_v20 = vadd.f32 %v2385_v10, %v2384_v1  ;;  %v2281_v51 = vpop.f32.mrb[94].mxu0 }
 0x2a5   :  { %v2282_v50 = vpop.f32.mrb[95].mxu0 }
 0x2a6   :  { %v2030_v2 = vadd.f32 %v1942_v16, %v603_v25  ;;  %v2031_v48 = vadd.f32 %v1945_v24, %v604_v19  ;;  %v2387_v25 = vpop.f32.mrb[94].mxu1  ;;  %v1966_v13 = vadd.f32 %v2386_v20, %v2280_v32  ;;  %v2283_v14 = vadd.f32 %v2282_v50, %v2281_v51 }
 0x2a7   :  { %v2388_v12 = vpop.f32.mrb[95].mxu1 }
 0x2a8   :  { %2123 = vst [vmem:[%s3681_s7 + $0x50] sm:$0xff] %v2030_v2  ;;  %2124 = vst [vmem:[%s3681_s7 + $0x58] sm:$0xff] %v2031_v48  ;;  %v2389_v59 = vadd.f32 %v2388_v12, %v2387_v25 }
 0x2aa   :  { %v1969_v19 = vadd.f32 %v2389_v59, %v2283_v14  ;;  %v2284_v2 = vpop.f32.mrb[96].mxu0  ;;  %v2390_v24 = vpop.f32.mrb[96].mxu1 }
 0x2ab   :  { %v2285_v48 = vpop.f32.mrb[97].mxu0  ;;  %v2391_v53 = vpop.f32.mrb[97].mxu1 }
 0x2ac   :  { %v2286_v26 = vadd.f32 %v2285_v48, %v2284_v2  ;;  %v2392_v28 = vadd.f32 %v2391_v53, %v2390_v24 }
 0x2ae   :  { %v1974_v33 = vadd.f32 %v2392_v28, %v2286_v26 }
 0x2af   :  { %v2593_v46 = vld [vmem:[%s3674_s0 + $0x60] sm:$0xff]  ;;  %v2594_v47 = vld [vmem:[%s3674_s0 + $0x68] sm:$0xff] }
 0x2b0   :  { %v605_v35 = vadd.f32 %v2593_v46, %v3462_v40  ;;  %v606_v34 = vadd.f32 %v2594_v47, %v3462_v40  ;;  %v2287_v46 = vpop.f32.mrb[98].mxu0 }
 0x2b1   :  { %v2288_v44 = vpop.f32.mrb[99].mxu0 }
 0x2b2   :  { %v2032_v39 = vadd.f32 %v1950_v0, %v605_v35  ;;  %v2033_v63 = vadd.f32 %v1953_v4, %v606_v34  ;;  %v2393_v35 = vpop.f32.mrb[98].mxu1  ;;  %v2289_v38 = vadd.f32 %v2288_v44, %v2287_v46 }
 0x2b3   :  { %v2394_v58 = vpop.f32.mrb[99].mxu1 }
 0x2b4   :  { %2125 = vst [vmem:[%s3681_s7 + $0x60] sm:$0xff] %v2032_v39  ;;  %2126 = vst [vmem:[%s3681_s7 + $0x68] sm:$0xff] %v2033_v63  ;;  %v2395_v9 = vadd.f32 %v2394_v58, %v2393_v35  ;;  %v2290_v39 = vpop.f32.mrb[100].mxu0  ;;  %v2396_v4 = vpop.f32.mrb[100].mxu1 }
 0x2b5   :  { %v2291_v63 = vpop.f32.mrb[101].mxu0  ;;  %v2397_v41 = vpop.f32.mrb[101].mxu1 }
 0x2b6   :  { %v1977_v34 = vadd.f32 %v2395_v9, %v2289_v38  ;;  %v2292_v42 = vadd.f32 %v2291_v63, %v2290_v39  ;;  %v2398_v5 = vadd.f32 %v2397_v41, %v2396_v4 }
 0x2b8   :  { %v1982_v8 = vadd.f32 %v2398_v5, %v2292_v42 }
 0x2bb   :  { %v2595_v37 = vld [vmem:[%s3674_s0 + $0x70] sm:$0xff]  ;;  %v2596_v29 = vld [vmem:[%s3674_s0 + $0x78] sm:$0xff] }
 0x2bc   :  { %v607_v49 = vadd.f32 %v2595_v37, %v3462_v40  ;;  %v608_v22 = vadd.f32 %v2596_v29, %v3462_v40  ;;  %v2293_v37 = vpop.f32.mrb[102].mxu0 }
 0x2bd   :  { %v2294_v52 = vpop.f32.mrb[103].mxu0 }
 0x2be   :  { %v2034_v56 = vadd.f32 %v1958_v60, %v607_v49  ;;  %v2035_v6 = vadd.f32 %v1961_v31, %v608_v22  ;;  %v2399_v49 = vpop.f32.mrb[102].mxu1  ;;  %v2295_v54 = vadd.f32 %v2294_v52, %v2293_v37 }
 0x2bf   :  { %v2400_v23 = vpop.f32.mrb[103].mxu1 }
 0x2c0   :  { %2127 = vst [vmem:[%s3681_s7 + $0x70] sm:$0xff] %v2034_v56  ;;  %2128 = vst [vmem:[%s3681_s7 + $0x78] sm:$0xff] %v2035_v6  ;;  %v2401_v3 = vadd.f32 %v2400_v23, %v2399_v49  ;;  %v2296_v56 = vpop.f32.mrb[104].mxu0  ;;  %v2402_v31 = vpop.f32.mrb[104].mxu1 }
 0x2c1   :  { %v2297_v6 = vpop.f32.mrb[105].mxu0  ;;  %v2403_v36 = vpop.f32.mrb[105].mxu1 }
 0x2c2   :  { %v1985_v22 = vadd.f32 %v2401_v3, %v2295_v54  ;;  %v2298_v1 = vadd.f32 %v2297_v6, %v2296_v56  ;;  %v2404_v32 = vadd.f32 %v2403_v36, %v2402_v31 }
 0x2c4   :  { %v1990_v25 = vadd.f32 %v2404_v32, %v2298_v1 }
 0x2c7   :  { %v2597_v57 = vld [vmem:[%s3674_s0 + $0x80] sm:$0xff]  ;;  %v2598_v15 = vld [vmem:[%s3674_s0 + $0x88] sm:$0xff] }
 0x2c8   :  { %v609_v18 = vadd.f32 %v2597_v57, %v3462_v40  ;;  %v610_v16 = vadd.f32 %v2598_v15, %v3462_v40  ;;  %v2299_v57 = vpop.f32.mrb[106].mxu0 }
 0x2c9   :  { %v2300_v20 = vpop.f32.mrb[107].mxu0 }
 0x2ca   :  { %v2036_v17 = vadd.f32 %v1966_v13, %v609_v18  ;;  %v2037_v21 = vadd.f32 %v1969_v19, %v610_v16  ;;  %v2405_v18 = vpop.f32.mrb[106].mxu1  ;;  %v2301_v50 = vadd.f32 %v2300_v20, %v2299_v57 }
 0x2cb   :  { %v2406_v51 = vpop.f32.mrb[107].mxu1 }
 0x2cc   :  { %2129 = vst [vmem:[%s3681_s7 + $0x80] sm:$0xff] %v2036_v17  ;;  %2130 = vst [vmem:[%s3681_s7 + $0x88] sm:$0xff] %v2037_v21  ;;  %v2407_v14 = vadd.f32 %v2406_v51, %v2405_v18  ;;  %v2302_v17 = vpop.f32.mrb[108].mxu0  ;;  %v2408_v19 = vpop.f32.mrb[108].mxu1 }
 0x2cd   :  { %v2303_v21 = vpop.f32.mrb[109].mxu0  ;;  %v2409_v2 = vpop.f32.mrb[109].mxu1 }
 0x2ce   :  { %v1993_v16 = vadd.f32 %v2407_v14, %v2301_v50  ;;  %v2304_v24 = vadd.f32 %v2303_v21, %v2302_v17  ;;  %v2410_v26 = vadd.f32 %v2409_v2, %v2408_v19 }
 0x2d0   :  { %v1998_v35 = vadd.f32 %v2410_v26, %v2304_v24 }
 0x2d3   :  { %v2599_v27 = vld [vmem:[%s3674_s0 + $0x90] sm:$0xff]  ;;  %v2600_v62 = vld [vmem:[%s3674_s0 + $0x98] sm:$0xff] }
 0x2d4   :  { %v611_v61 = vadd.f32 %v2599_v27, %v3462_v40  ;;  %v612_v0 = vadd.f32 %v2600_v62, %v3462_v40  ;;  %v2305_v27 = vpop.f32.mrb[110].mxu0 }
 0x2d5   :  { %v2306_v28 = vpop.f32.mrb[111].mxu0 }
 0x2d6   :  { %v2038_v47 = vadd.f32 %v1974_v33, %v611_v61  ;;  %v2039_v30 = vadd.f32 %v1977_v34, %v612_v0  ;;  %v2411_v61 = vpop.f32.mrb[110].mxu1  ;;  %v2307_v44 = vadd.f32 %v2306_v28, %v2305_v27 }
 0x2d7   :  { %v2412_v46 = vpop.f32.mrb[111].mxu1 }
 0x2d8   :  { %2131 = vst [vmem:[%s3681_s7 + $0x90] sm:$0xff] %v2038_v47  ;;  %2132 = vst [vmem:[%s3681_s7 + $0x98] sm:$0xff] %v2039_v30  ;;  %v2413_v38 = vadd.f32 %v2412_v46, %v2411_v61  ;;  %v2308_v47 = vpop.f32.mrb[112].mxu0  ;;  %v2414_v34 = vpop.f32.mrb[112].mxu1 }
 0x2d9   :  { %v2309_v30 = vpop.f32.mrb[113].mxu0  ;;  %v2415_v39 = vpop.f32.mrb[113].mxu1 }
 0x2da   :  { %v2001_v0 = vadd.f32 %v2413_v38, %v2307_v44  ;;  %v2310_v4 = vadd.f32 %v2309_v30, %v2308_v47  ;;  %v2416_v42 = vadd.f32 %v2415_v39, %v2414_v34 }
 0x2dc   :  { %v2006_v49 = vadd.f32 %v2416_v42, %v2310_v4 }
 0x2df   :  { %v2601_v43 = vld [vmem:[%s3674_s0 + $0xa0] sm:$0xff]  ;;  %v2602_v55 = vld [vmem:[%s3674_s0 + $0xa8] sm:$0xff] }
 0x2e0   :  { %v613_v45 = vadd.f32 %v2601_v43, %v3462_v40  ;;  %v614_v60 = vadd.f32 %v2602_v55, %v3462_v40  ;;  %v2311_v43 = vpop.f32.mrb[114].mxu0 }
 0x2e1   :  { %v2312_v5 = vpop.f32.mrb[115].mxu0 }
 0x2e2   :  { %v2040_v29 = vadd.f32 %v1982_v8, %v613_v45  ;;  %v2041_v7 = vadd.f32 %v1985_v22, %v614_v60  ;;  %v2417_v45 = vpop.f32.mrb[114].mxu1  ;;  %v2313_v52 = vadd.f32 %v2312_v5, %v2311_v43 }
 0x2e3   :  { %v2418_v37 = vpop.f32.mrb[115].mxu1 }
 0x2e4   :  { %2133 = vst [vmem:[%s3681_s7 + $0xa0] sm:$0xff] %v2040_v29  ;;  %2134 = vst [vmem:[%s3681_s7 + $0xa8] sm:$0xff] %v2041_v7  ;;  %v2419_v54 = vadd.f32 %v2418_v37, %v2417_v45  ;;  %v2314_v29 = vpop.f32.mrb[116].mxu0  ;;  %v2420_v22 = vpop.f32.mrb[116].mxu1 }
 0x2e5   :  { %v2315_v7 = vpop.f32.mrb[117].mxu0  ;;  %v2421_v56 = vpop.f32.mrb[117].mxu1 }
 0x2e6   :  { %v2009_v60 = vadd.f32 %v2419_v54, %v2313_v52  ;;  %v2316_v31 = vadd.f32 %v2315_v7, %v2314_v29  ;;  %v2422_v1 = vadd.f32 %v2421_v56, %v2420_v22 }
 0x2e8   :  { %v2014_v18 = vadd.f32 %v2422_v1, %v2316_v31 }
 0x2eb   :  { %v2603_v11 = vld [vmem:[%s3674_s0 + $0xb0] sm:$0xff]  ;;  %v2604_v12 = vld [vmem:[%s3674_s0 + $0xb8] sm:$0xff] }
 0x2ec   :  { %v615_v10 = vadd.f32 %v2603_v11, %v3462_v40  ;;  %v616_v13 = vadd.f32 %v2604_v12, %v3462_v40  ;;  %v2317_v11 = vpop.f32.mrb[118].mxu0 }
 0x2ed   :  { %v2318_v32 = vpop.f32.mrb[119].mxu0 }
 0x2ee   :  { %v2042_v15 = vadd.f32 %v1990_v25, %v615_v10  ;;  %v2043_v59 = vadd.f32 %v1993_v16, %v616_v13  ;;  %v2423_v10 = vpop.f32.mrb[118].mxu1  ;;  %v2319_v20 = vadd.f32 %v2318_v32, %v2317_v11 }
 0x2ef   :  { %v2424_v57 = vpop.f32.mrb[119].mxu1 }
 0x2f0   :  { %2135 = vst [vmem:[%s3681_s7 + $0xb0] sm:$0xff] %v2042_v15  ;;  %2136 = vst [vmem:[%s3681_s7 + $0xb8] sm:$0xff] %v2043_v59  ;;  %v2425_v50 = vadd.f32 %v2424_v57, %v2423_v10 }
 0x2f2   :  { %v2017_v13 = vadd.f32 %v2425_v50, %v2319_v20 }
 0x2f7   :  { %v2605_v48 = vld [vmem:[%s3674_s0 + $0xc0] sm:$0xff]  ;;  %v2606_v58 = vld [vmem:[%s3674_s0 + $0xc8] sm:$0xff] }
 0x2f8   :  { %v617_v53 = vadd.f32 %v2605_v48, %v3462_v40  ;;  %v618_v33 = vadd.f32 %v2606_v58, %v3462_v40 }
 0x2fa   :  { %v2044_v62 = vadd.f32 %v1998_v35, %v617_v53  ;;  %v2045_v9 = vadd.f32 %v2001_v0, %v618_v33 }
 0x2fc   :  { %2137 = vst [vmem:[%s3681_s7 + $0xc0] sm:$0xff] %v2044_v62  ;;  %2138 = vst [vmem:[%s3681_s7 + $0xc8] sm:$0xff] %v2045_v9 }
 0x303   :  { %v2607_v63 = vld [vmem:[%s3674_s0 + $0xd0] sm:$0xff]  ;;  %v2608_v23 = vld [vmem:[%s3674_s0 + $0xd8] sm:$0xff] }
 0x304   :  { %v619_v41 = vadd.f32 %v2607_v63, %v3462_v40  ;;  %v620_v8 = vadd.f32 %v2608_v23, %v3462_v40 }
 0x306   :  { %v2046_v55 = vadd.f32 %v2006_v49, %v619_v41  ;;  %v2047_v3 = vadd.f32 %v2009_v60, %v620_v8 }
 0x308   :  { %2139 = vst [vmem:[%s3681_s7 + $0xd0] sm:$0xff] %v2046_v55  ;;  %2140 = vst [vmem:[%s3681_s7 + $0xd8] sm:$0xff] %v2047_v3 }
 0x30f   :  { %v2609_v6 = vld [vmem:[%s3674_s0 + $0xe0] sm:$0xff]  ;;  %v2610_v51 = vld [vmem:[%s3674_s0 + $0xe8] sm:$0xff] }
 0x310   :  { %v621_v36 = vadd.f32 %v2609_v6, %v3462_v40  ;;  %v622_v25 = vadd.f32 %v2610_v51, %v3462_v40 }
 0x312   :  { %v2048_v12 = vadd.f32 %v2014_v18, %v621_v36  ;;  %v2049_v14 = vadd.f32 %v2017_v13, %v622_v25 }
 0x314   :  { %2141 = vst [vmem:[%s3681_s7 + $0xe0] sm:$0xff] %v2048_v12  ;;  %2142 = vst [vmem:[%s3681_s7 + $0xe8] sm:$0xff] %v2049_v14 }

</bundles_post_ra>
